<compile_context>
chip_gen: v6e
topology: v6e:2x2x1
jax: 0.10.0
libtpu: 0.0.40
codegen_flags: <defaults>
</compile_context>

<pallas_src>
import functools

import jax
import jax.numpy as jnp
from jax.experimental import pallas as pl
from jax.experimental.pallas import tpu as pltpu

D_MODEL_BERT = 768   # hidden size of the BERT outputs / Classifier input
D_HID = 64           # Classifier hidden width

# Row tile over flattened sentences.  128 rows x 768 f32 gather buffer (~0.4 MiB)
# + ~0.3 MiB of resident weights stays far inside the scoped-VMEM budget on
# v5e (16 MiB), v6e (32 MiB) and v7x (32 MiB scoped / 64 MiB physical).
TM_DEFAULT = 128


def _round_up(x, m):
    return (x + m - 1) // m * m


def _classifier_kernel(rows_ref,                      # SMEM (BN_pad,) int32 flat row ids
                       mask_ref,                      # VMEM (tm, 1)  f32
                       top_ref,                       # HBM  (B*S, H) — raw ref, manual DMA
                       w1_ref, b1_ref, w2_ref, b2_ref, w3_ref, b3_ref,
                       out_ref,                       # VMEM (tm, 1)  f32
                       xbuf, sem,                     # scratch: (tm, H) VMEM, DMA sem
                       *, tm):
    i = pl.program_id(0)
    base = i * tm

    # ---- Fused CLS gather: DMA `tm` sentence rows from top_vec (HBM) into VMEM.
    # All copies are issued up-front (deep overlap), then drained.  Destination
    # row offsets are static (Python-unrolled); only the HBM source row is dynamic.
    for r in range(tm):
        row = rows_ref[base + r]
        pltpu.make_async_copy(top_ref.at[pl.ds(row, 1), :],
                              xbuf.at[pl.ds(r, 1), :],
                              sem.at[0]).start()

    @pl.loop(0, tm)
    def _drain(_):
        # Same-shaped descriptor; each wait retires one row copy on the shared sem.
        pltpu.make_async_copy(top_ref.at[pl.ds(0, 1), :],
                              xbuf.at[pl.ds(0, 1), :],
                              sem.at[0]).wait()

    # ---- 3-layer MLP head: bf16 MXU matmuls, f32 accumulation.
    x = xbuf[...].astype(jnp.bfloat16)
    m = mask_ref[...]

    h1 = jnp.dot(x, w1_ref[...], preferred_element_type=jnp.float32) + b1_ref[...]
    h1 = jnp.maximum(h1, 0.0)

    h2 = jnp.dot(h1.astype(jnp.bfloat16), w2_ref[...],
                 preferred_element_type=jnp.float32) + b2_ref[...]
    h2 = jnp.maximum(h2, 0.0)

    # 64 -> 1 projection on VPU + lane reduction (avoid a 1-wide MXU matmul).
    s = jnp.sum(h2 * w3_ref[...], axis=-1, keepdims=True) + b3_ref[...]

    # Final mask multiply (also zeroes the padded rows).
    out_ref[...] = s * m


def classifier_pallas(top_vec, clss, mask_cls, params, *, tm=TM_DEFAULT):
    """Fused CLS gather + Classifier head.

    top_vec:  (B, S, H) f32   BERT last_hidden_state
    clss:     (B, N)    int32 positions of the [CLS] tokens
    mask_cls: (B, N)    bool
    returns   (B, N)    f32   sent_scores
    """
    B, S, H = top_vec.shape
    N = clss.shape[1]
    BN = B * N

    w1, b1, w2, b2, w3, b3 = params

    # Tile size: at least 8 rows, no bigger than (padded) BN.
    tm_eff = min(tm, _round_up(BN, 8))
    bn_pad = _round_up(BN, tm_eff)
    num_tiles = bn_pad // tm_eff

    # Flat HBM row index of every [CLS] token; padded rows point at row 0
    # (their output is masked to zero and sliced off anyway).
    rows = (jnp.arange(B, dtype=jnp.int32)[:, None] * S
            + clss.astype(jnp.int32)).reshape(BN)
    rows = jnp.pad(rows, (0, bn_pad - BN))

    mask = mask_cls.astype(jnp.float32).reshape(BN, 1)
    mask = jnp.pad(mask, ((0, bn_pad - BN), (0, 0)))

    top_flat = top_vec.reshape(B * S, H)          # metadata-only reshape

    # bf16 weights for the MXU; biases + final projection stay f32.
    w1_bf = w1.astype(jnp.bfloat16)
    w2_bf = w2.astype(jnp.bfloat16)
    w3_row = w3.reshape(1, D_HID).astype(jnp.float32)
    b3_ = b3.reshape(1, 1).astype(jnp.float32)

    kernel = functools.partial(_classifier_kernel, tm=tm_eff)

    cidx = lambda i, rows_ref: (0, 0)             # weights: VMEM-resident across tiles
    grid_spec = pltpu.PrefetchScalarGridSpec(
        num_scalar_prefetch=1,
        grid=(num_tiles,),
        in_specs=[
            pl.BlockSpec((tm_eff, 1), lambda i, rows_ref: (i, 0)),   # mask tile
            pl.BlockSpec(memory_space=pl.ANY),                       # top_vec (HBM)
            pl.BlockSpec((H, D_HID), cidx),                          # w1
            pl.BlockSpec((1, D_HID), cidx),                          # b1
            pl.BlockSpec((D_HID, D_HID), cidx),                      # w2
            pl.BlockSpec((1, D_HID), cidx),                          # b2
            pl.BlockSpec((1, D_HID), cidx),                          # w3 (row)
            pl.BlockSpec((1, 1), cidx),                              # b3
        ],
        out_specs=pl.BlockSpec((tm_eff, 1), lambda i, rows_ref: (i, 0)),
        scratch_shapes=[
            pltpu.VMEM((tm_eff, H), top_flat.dtype),   # gathered sentence tile
            pltpu.SemaphoreType.DMA((1,)),
        ],
    )

    out = pl.pallas_call(
        kernel,
        out_shape=jax.ShapeDtypeStruct((bn_pad, 1), jnp.float32),
        grid_spec=grid_spec,
        compiler_params=pltpu.CompilerParams(
            dimension_semantics=("parallel",)),        # v7x: both TCs; no-op on v5e/v6e
    )(rows, mask, top_flat, w1_bf, b1, w2_bf, b2, w3_row, b3_)

    return out[:BN, 0].reshape(B, N)


def summarizer_forward(top_vec, clss, mask_cls, params):
    """Mirror of Summarizer.forward (Classifier encoder branch), minus BERT."""
    sent_scores = classifier_pallas(top_vec, clss, mask_cls, params)   # (B, N)
    return sent_scores, mask_cls


def init_classifier_params(key, hidden_size=D_MODEL_BERT):
    k1, k2, k3, k4, k5, k6 = jax.random.split(key, 6)
    scale = 0.02
    w1 = scale * jax.random.normal(k1, (hidden_size, D_HID), jnp.float32)
    b1 = scale * jax.random.normal(k4, (1, D_HID), jnp.float32)
    w2 = scale * jax.random.normal(k2, (D_HID, D_HID), jnp.float32)
    b2 = scale * jax.random.normal(k5, (1, D_HID), jnp.float32)
    w3 = scale * jax.random.normal(k3, (D_HID, 1), jnp.float32)
    b3 = scale * jax.random.normal(k6, (1, 1), jnp.float32)
    return (w1, b1, w2, b2, w3, b3)


def reference_forward(top_vec, clss, mask_cls, params):
    """Pure-JAX reference matching the PyTorch semantics; matmul inputs are cast
    to bf16 (f32 accumulation) to mirror the kernel's precision."""
    w1, b1, w2, b2, w3, b3 = params
    B = top_vec.shape[0]
    mask_f = mask_cls.astype(jnp.float32)
    sents = top_vec[jnp.arange(B)[:, None], clss].astype(jnp.float32)
    sents = sents * mask_f[:, :, None]
    h = jnp.dot(sents.astype(jnp.bfloat16), w1.astype(jnp.bfloat16),
                preferred_element_type=jnp.float32) + b1
    h = jnp.maximum(h, 0.0)
    h = jnp.dot(h.astype(jnp.bfloat16), w2.astype(jnp.bfloat16),
                preferred_element_type=jnp.float32) + b2
    h = jnp.maximum(h, 0.0)
    s = (jnp.dot(h, w3, preferred_element_type=jnp.float32) + b3)[..., 0]
    return s * mask_f


if __name__ == "__main__":
    key = jax.random.PRNGKey(0)
    k_vec, k_par = jax.random.split(key)

    B = 2           # batch
    S = 64          # token sequence length
    N = 8           # number of sentences (CLS positions) per doc
    H = D_MODEL_BERT

    # Synthetic deterministic BERT output (stand-in for last_hidden_state).
    top_vec = jax.random.normal(k_vec, (B, S, H), jnp.float32)

    # CLS token positions and sentence mask (last 2 sentences of doc 1 padded).
    clss = jnp.tile(jnp.arange(N, dtype=jnp.int32)[None, :] * (S // N), (B, 1))
    mask_cls = jnp.array(
        [[1, 1, 1, 1, 1, 1, 1, 1],
         [1, 1, 1, 1, 1, 1, 0, 0]], dtype=jnp.bool_)

    params = init_classifier_params(k_par)

    sent_scores, mask_out = summarizer_forward(top_vec, clss, mask_cls, params)
    sent_scores = jax.block_until_ready(sent_scores)

    ref = reference_forward(top_vec, clss, mask_cls, params)
    assert sent_scores.shape == (B, N)
    assert jnp.allclose(sent_scores, ref, atol=1e-4, rtol=1e-3), (
        float(jnp.max(jnp.abs(sent_scores - ref))))
    assert bool(jnp.all(mask_out == mask_cls))

    print("KERNEL_OK")
</pallas_src>

<mosaic_0001>
module attributes {stable_mosaic.version = 11 : i64} {
  func.func @_classifier_kernel(%arg0: i32, %arg1: memref<16xi32, #tpu.memory_space<smem>>, %arg2: memref<16x1xf32, #tpu.memory_space<vmem>>, %arg3: memref<128x768xf32, #tpu.memory_space<any>>, %arg4: memref<768x64xbf16, #tpu.memory_space<vmem>>, %arg5: memref<1x64xf32, #tpu.memory_space<vmem>>, %arg6: memref<64x64xbf16, #tpu.memory_space<vmem>>, %arg7: memref<1x64xf32, #tpu.memory_space<vmem>>, %arg8: memref<1x64xf32, #tpu.memory_space<vmem>>, %arg9: memref<1x1xf32, #tpu.memory_space<vmem>>, %arg10: memref<16x1xf32, #tpu.memory_space<vmem>>, %arg11: memref<16x768xf32, #tpu.memory_space<vmem>>, %arg12: memref<1x!tpu.dma_semaphore, #tpu.memory_space<semaphore_mem>>) attributes {dimension_semantics = [#tpu.dimension_semantics<parallel>], iteration_bounds = array<i64: 1>, scalar_prefetch = 1 : i64, scratch_operands = 2 : i64, tpu.core_type = #tpu.core_type<tc>, window_params = [{transform_indices = @transform_0, window_bounds = array<i64: 16, 1>}, {}, {pipeline_mode = #tpu.pipeline_mode<synchronous>, transform_indices = @transform_2, window_bounds = array<i64: 768, 64>}, {pipeline_mode = #tpu.pipeline_mode<synchronous>, transform_indices = @transform_3, window_bounds = array<i64: 1, 64>}, {pipeline_mode = #tpu.pipeline_mode<synchronous>, transform_indices = @transform_4, window_bounds = array<i64: 64, 64>}, {pipeline_mode = #tpu.pipeline_mode<synchronous>, transform_indices = @transform_5, window_bounds = array<i64: 1, 64>}, {pipeline_mode = #tpu.pipeline_mode<synchronous>, transform_indices = @transform_6, window_bounds = array<i64: 1, 64>}, {pipeline_mode = #tpu.pipeline_mode<synchronous>, transform_indices = @transform_7, window_bounds = array<i64: 1, 1>}, {transform_indices = @transform_8, window_bounds = array<i64: 16, 1>}]} {
    %c16_i32 = arith.constant 16 : i32
    %0 = arith.muli %arg0, %c16_i32 : i32
    %c0_i32 = arith.constant 0 : i32
    %1 = arith.addi %0, %c0_i32 : i32
    %2 = arith.index_cast %1 : i32 to index
    %3 = memref.load %arg1[%2] : memref<16xi32, #tpu.memory_space<smem>>
    %c0_i32_0 = arith.constant 0 : i32
    %c0_i32_1 = arith.constant 0 : i32
    %4 = tpu.memref_slice %arg3[%3, %c0_i32_1] : memref<128x768xf32, #tpu.memory_space<any>> -> memref<1x768xf32, #tpu.memory_space<any>>
    %c0_i32_2 = arith.constant 0 : i32
    %c0_i32_3 = arith.constant 0 : i32
    %5 = tpu.memref_slice %arg11[%c0_i32_2, %c0_i32_3] : memref<16x768xf32, #tpu.memory_space<vmem>> -> memref<1x768xf32, #tpu.memory_space<vmem>>
    %6 = tpu.memref_slice %arg12[%c0_i32_0] : memref<1x!tpu.dma_semaphore, #tpu.memory_space<semaphore_mem>> -> memref<1x!tpu.dma_semaphore, #tpu.memory_space<semaphore_mem>>
    %7 = tpu.memref_squeeze %6 : memref<1x!tpu.dma_semaphore, #tpu.memory_space<semaphore_mem>> -> memref<!tpu.dma_semaphore, #tpu.memory_space<semaphore_mem>>
    tpu.enqueue_dma source(%4 : memref<1x768xf32, #tpu.memory_space<any>>) target(%5 : memref<1x768xf32, #tpu.memory_space<vmem>>) target_semaphore(%7 : memref<!tpu.dma_semaphore, #tpu.memory_space<semaphore_mem>>)
    %c1_i32 = arith.constant 1 : i32
    %8 = arith.addi %0, %c1_i32 : i32
    %9 = arith.index_cast %8 : i32 to index
    %10 = memref.load %arg1[%9] : memref<16xi32, #tpu.memory_space<smem>>
    %c0_i32_4 = arith.constant 0 : i32
    %c0_i32_5 = arith.constant 0 : i32
    %11 = tpu.memref_slice %arg3[%10, %c0_i32_5] : memref<128x768xf32, #tpu.memory_space<any>> -> memref<1x768xf32, #tpu.memory_space<any>>
    %c1_i32_6 = arith.constant 1 : i32
    %c0_i32_7 = arith.constant 0 : i32
    %12 = tpu.memref_slice %arg11[%c1_i32_6, %c0_i32_7] : memref<16x768xf32, #tpu.memory_space<vmem>> -> memref<1x768xf32, #tpu.memory_space<vmem>>
    %13 = tpu.memref_slice %arg12[%c0_i32_4] : memref<1x!tpu.dma_semaphore, #tpu.memory_space<semaphore_mem>> -> memref<1x!tpu.dma_semaphore, #tpu.memory_space<semaphore_mem>>
    %14 = tpu.memref_squeeze %13 : memref<1x!tpu.dma_semaphore, #tpu.memory_space<semaphore_mem>> -> memref<!tpu.dma_semaphore, #tpu.memory_space<semaphore_mem>>
    tpu.enqueue_dma source(%11 : memref<1x768xf32, #tpu.memory_space<any>>) target(%12 : memref<1x768xf32, #tpu.memory_space<vmem>>) target_semaphore(%14 : memref<!tpu.dma_semaphore, #tpu.memory_space<semaphore_mem>>)
    %c2_i32 = arith.constant 2 : i32
    %15 = arith.addi %0, %c2_i32 : i32
    %16 = arith.index_cast %15 : i32 to index
    %17 = memref.load %arg1[%16] : memref<16xi32, #tpu.memory_space<smem>>
    %c0_i32_8 = arith.constant 0 : i32
    %c0_i32_9 = arith.constant 0 : i32
    %18 = tpu.memref_slice %arg3[%17, %c0_i32_9] : memref<128x768xf32, #tpu.memory_space<any>> -> memref<1x768xf32, #tpu.memory_space<any>>
    %c2_i32_10 = arith.constant 2 : i32
    %c0_i32_11 = arith.constant 0 : i32
    %19 = tpu.memref_slice %arg11[%c2_i32_10, %c0_i32_11] : memref<16x768xf32, #tpu.memory_space<vmem>> -> memref<1x768xf32, #tpu.memory_space<vmem>>
    %20 = tpu.memref_slice %arg12[%c0_i32_8] : memref<1x!tpu.dma_semaphore, #tpu.memory_space<semaphore_mem>> -> memref<1x!tpu.dma_semaphore, #tpu.memory_space<semaphore_mem>>
    %21 = tpu.memref_squeeze %20 : memref<1x!tpu.dma_semaphore, #tpu.memory_space<semaphore_mem>> -> memref<!tpu.dma_semaphore, #tpu.memory_space<semaphore_mem>>
    tpu.enqueue_dma source(%18 : memref<1x768xf32, #tpu.memory_space<any>>) target(%19 : memref<1x768xf32, #tpu.memory_space<vmem>>) target_semaphore(%21 : memref<!tpu.dma_semaphore, #tpu.memory_space<semaphore_mem>>)
    %c3_i32 = arith.constant 3 : i32
    %22 = arith.addi %0, %c3_i32 : i32
    %23 = arith.index_cast %22 : i32 to index
    %24 = memref.load %arg1[%23] : memref<16xi32, #tpu.memory_space<smem>>
    %c0_i32_12 = arith.constant 0 : i32
    %c0_i32_13 = arith.constant 0 : i32
    %25 = tpu.memref_slice %arg3[%24, %c0_i32_13] : memref<128x768xf32, #tpu.memory_space<any>> -> memref<1x768xf32, #tpu.memory_space<any>>
    %c3_i32_14 = arith.constant 3 : i32
    %c0_i32_15 = arith.constant 0 : i32
    %26 = tpu.memref_slice %arg11[%c3_i32_14, %c0_i32_15] : memref<16x768xf32, #tpu.memory_space<vmem>> -> memref<1x768xf32, #tpu.memory_space<vmem>>
    %27 = tpu.memref_slice %arg12[%c0_i32_12] : memref<1x!tpu.dma_semaphore, #tpu.memory_space<semaphore_mem>> -> memref<1x!tpu.dma_semaphore, #tpu.memory_space<semaphore_mem>>
    %28 = tpu.memref_squeeze %27 : memref<1x!tpu.dma_semaphore, #tpu.memory_space<semaphore_mem>> -> memref<!tpu.dma_semaphore, #tpu.memory_space<semaphore_mem>>
    tpu.enqueue_dma source(%25 : memref<1x768xf32, #tpu.memory_space<any>>) target(%26 : memref<1x768xf32, #tpu.memory_space<vmem>>) target_semaphore(%28 : memref<!tpu.dma_semaphore, #tpu.memory_space<semaphore_mem>>)
    %c4_i32 = arith.constant 4 : i32
    %29 = arith.addi %0, %c4_i32 : i32
    %30 = arith.index_cast %29 : i32 to index
    %31 = memref.load %arg1[%30] : memref<16xi32, #tpu.memory_space<smem>>
    %c0_i32_16 = arith.constant 0 : i32
    %c0_i32_17 = arith.constant 0 : i32
    %32 = tpu.memref_slice %arg3[%31, %c0_i32_17] : memref<128x768xf32, #tpu.memory_space<any>> -> memref<1x768xf32, #tpu.memory_space<any>>
    %c4_i32_18 = arith.constant 4 : i32
    %c0_i32_19 = arith.constant 0 : i32
    %33 = tpu.memref_slice %arg11[%c4_i32_18, %c0_i32_19] : memref<16x768xf32, #tpu.memory_space<vmem>> -> memref<1x768xf32, #tpu.memory_space<vmem>>
    %34 = tpu.memref_slice %arg12[%c0_i32_16] : memref<1x!tpu.dma_semaphore, #tpu.memory_space<semaphore_mem>> -> memref<1x!tpu.dma_semaphore, #tpu.memory_space<semaphore_mem>>
    %35 = tpu.memref_squeeze %34 : memref<1x!tpu.dma_semaphore, #tpu.memory_space<semaphore_mem>> -> memref<!tpu.dma_semaphore, #tpu.memory_space<semaphore_mem>>
    tpu.enqueue_dma source(%32 : memref<1x768xf32, #tpu.memory_space<any>>) target(%33 : memref<1x768xf32, #tpu.memory_space<vmem>>) target_semaphore(%35 : memref<!tpu.dma_semaphore, #tpu.memory_space<semaphore_mem>>)
    %c5_i32 = arith.constant 5 : i32
    %36 = arith.addi %0, %c5_i32 : i32
    %37 = arith.index_cast %36 : i32 to index
    %38 = memref.load %arg1[%37] : memref<16xi32, #tpu.memory_space<smem>>
    %c0_i32_20 = arith.constant 0 : i32
    %c0_i32_21 = arith.constant 0 : i32
    %39 = tpu.memref_slice %arg3[%38, %c0_i32_21] : memref<128x768xf32, #tpu.memory_space<any>> -> memref<1x768xf32, #tpu.memory_space<any>>
    %c5_i32_22 = arith.constant 5 : i32
    %c0_i32_23 = arith.constant 0 : i32
    %40 = tpu.memref_slice %arg11[%c5_i32_22, %c0_i32_23] : memref<16x768xf32, #tpu.memory_space<vmem>> -> memref<1x768xf32, #tpu.memory_space<vmem>>
    %41 = tpu.memref_slice %arg12[%c0_i32_20] : memref<1x!tpu.dma_semaphore, #tpu.memory_space<semaphore_mem>> -> memref<1x!tpu.dma_semaphore, #tpu.memory_space<semaphore_mem>>
    %42 = tpu.memref_squeeze %41 : memref<1x!tpu.dma_semaphore, #tpu.memory_space<semaphore_mem>> -> memref<!tpu.dma_semaphore, #tpu.memory_space<semaphore_mem>>
    tpu.enqueue_dma source(%39 : memref<1x768xf32, #tpu.memory_space<any>>) target(%40 : memref<1x768xf32, #tpu.memory_space<vmem>>) target_semaphore(%42 : memref<!tpu.dma_semaphore, #tpu.memory_space<semaphore_mem>>)
    %c6_i32 = arith.constant 6 : i32
    %43 = arith.addi %0, %c6_i32 : i32
    %44 = arith.index_cast %43 : i32 to index
    %45 = memref.load %arg1[%44] : memref<16xi32, #tpu.memory_space<smem>>
    %c0_i32_24 = arith.constant 0 : i32
    %c0_i32_25 = arith.constant 0 : i32
    %46 = tpu.memref_slice %arg3[%45, %c0_i32_25] : memref<128x768xf32, #tpu.memory_space<any>> -> memref<1x768xf32, #tpu.memory_space<any>>
    %c6_i32_26 = arith.constant 6 : i32
    %c0_i32_27 = arith.constant 0 : i32
    %47 = tpu.memref_slice %arg11[%c6_i32_26, %c0_i32_27] : memref<16x768xf32, #tpu.memory_space<vmem>> -> memref<1x768xf32, #tpu.memory_space<vmem>>
    %48 = tpu.memref_slice %arg12[%c0_i32_24] : memref<1x!tpu.dma_semaphore, #tpu.memory_space<semaphore_mem>> -> memref<1x!tpu.dma_semaphore, #tpu.memory_space<semaphore_mem>>
    %49 = tpu.memref_squeeze %48 : memref<1x!tpu.dma_semaphore, #tpu.memory_space<semaphore_mem>> -> memref<!tpu.dma_semaphore, #tpu.memory_space<semaphore_mem>>
    tpu.enqueue_dma source(%46 : memref<1x768xf32, #tpu.memory_space<any>>) target(%47 : memref<1x768xf32, #tpu.memory_space<vmem>>) target_semaphore(%49 : memref<!tpu.dma_semaphore, #tpu.memory_space<semaphore_mem>>)
    %c7_i32 = arith.constant 7 : i32
    %50 = arith.addi %0, %c7_i32 : i32
    %51 = arith.index_cast %50 : i32 to index
    %52 = memref.load %arg1[%51] : memref<16xi32, #tpu.memory_space<smem>>
    %c0_i32_28 = arith.constant 0 : i32
    %c0_i32_29 = arith.constant 0 : i32
    %53 = tpu.memref_slice %arg3[%52, %c0_i32_29] : memref<128x768xf32, #tpu.memory_space<any>> -> memref<1x768xf32, #tpu.memory_space<any>>
    %c7_i32_30 = arith.constant 7 : i32
    %c0_i32_31 = arith.constant 0 : i32
    %54 = tpu.memref_slice %arg11[%c7_i32_30, %c0_i32_31] : memref<16x768xf32, #tpu.memory_space<vmem>> -> memref<1x768xf32, #tpu.memory_space<vmem>>
    %55 = tpu.memref_slice %arg12[%c0_i32_28] : memref<1x!tpu.dma_semaphore, #tpu.memory_space<semaphore_mem>> -> memref<1x!tpu.dma_semaphore, #tpu.memory_space<semaphore_mem>>
    %56 = tpu.memref_squeeze %55 : memref<1x!tpu.dma_semaphore, #tpu.memory_space<semaphore_mem>> -> memref<!tpu.dma_semaphore, #tpu.memory_space<semaphore_mem>>
    tpu.enqueue_dma source(%53 : memref<1x768xf32, #tpu.memory_space<any>>) target(%54 : memref<1x768xf32, #tpu.memory_space<vmem>>) target_semaphore(%56 : memref<!tpu.dma_semaphore, #tpu.memory_space<semaphore_mem>>)
    %c8_i32 = arith.constant 8 : i32
    %57 = arith.addi %0, %c8_i32 : i32
    %58 = arith.index_cast %57 : i32 to index
    %59 = memref.load %arg1[%58] : memref<16xi32, #tpu.memory_space<smem>>
    %c0_i32_32 = arith.constant 0 : i32
    %c0_i32_33 = arith.constant 0 : i32
    %60 = tpu.memref_slice %arg3[%59, %c0_i32_33] : memref<128x768xf32, #tpu.memory_space<any>> -> memref<1x768xf32, #tpu.memory_space<any>>
    %c8_i32_34 = arith.constant 8 : i32
    %c0_i32_35 = arith.constant 0 : i32
    %61 = tpu.memref_slice %arg11[%c8_i32_34, %c0_i32_35] : memref<16x768xf32, #tpu.memory_space<vmem>> -> memref<1x768xf32, #tpu.memory_space<vmem>>
    %62 = tpu.memref_slice %arg12[%c0_i32_32] : memref<1x!tpu.dma_semaphore, #tpu.memory_space<semaphore_mem>> -> memref<1x!tpu.dma_semaphore, #tpu.memory_space<semaphore_mem>>
    %63 = tpu.memref_squeeze %62 : memref<1x!tpu.dma_semaphore, #tpu.memory_space<semaphore_mem>> -> memref<!tpu.dma_semaphore, #tpu.memory_space<semaphore_mem>>
    tpu.enqueue_dma source(%60 : memref<1x768xf32, #tpu.memory_space<any>>) target(%61 : memref<1x768xf32, #tpu.memory_space<vmem>>) target_semaphore(%63 : memref<!tpu.dma_semaphore, #tpu.memory_space<semaphore_mem>>)
    %c9_i32 = arith.constant 9 : i32
    %64 = arith.addi %0, %c9_i32 : i32
    %65 = arith.index_cast %64 : i32 to index
    %66 = memref.load %arg1[%65] : memref<16xi32, #tpu.memory_space<smem>>
    %c0_i32_36 = arith.constant 0 : i32
    %c0_i32_37 = arith.constant 0 : i32
    %67 = tpu.memref_slice %arg3[%66, %c0_i32_37] : memref<128x768xf32, #tpu.memory_space<any>> -> memref<1x768xf32, #tpu.memory_space<any>>
    %c9_i32_38 = arith.constant 9 : i32
    %c0_i32_39 = arith.constant 0 : i32
    %68 = tpu.memref_slice %arg11[%c9_i32_38, %c0_i32_39] : memref<16x768xf32, #tpu.memory_space<vmem>> -> memref<1x768xf32, #tpu.memory_space<vmem>>
    %69 = tpu.memref_slice %arg12[%c0_i32_36] : memref<1x!tpu.dma_semaphore, #tpu.memory_space<semaphore_mem>> -> memref<1x!tpu.dma_semaphore, #tpu.memory_space<semaphore_mem>>
    %70 = tpu.memref_squeeze %69 : memref<1x!tpu.dma_semaphore, #tpu.memory_space<semaphore_mem>> -> memref<!tpu.dma_semaphore, #tpu.memory_space<semaphore_mem>>
    tpu.enqueue_dma source(%67 : memref<1x768xf32, #tpu.memory_space<any>>) target(%68 : memref<1x768xf32, #tpu.memory_space<vmem>>) target_semaphore(%70 : memref<!tpu.dma_semaphore, #tpu.memory_space<semaphore_mem>>)
    %c10_i32 = arith.constant 10 : i32
    %71 = arith.addi %0, %c10_i32 : i32
    %72 = arith.index_cast %71 : i32 to index
    %73 = memref.load %arg1[%72] : memref<16xi32, #tpu.memory_space<smem>>
    %c0_i32_40 = arith.constant 0 : i32
    %c0_i32_41 = arith.constant 0 : i32
    %74 = tpu.memref_slice %arg3[%73, %c0_i32_41] : memref<128x768xf32, #tpu.memory_space<any>> -> memref<1x768xf32, #tpu.memory_space<any>>
    %c10_i32_42 = arith.constant 10 : i32
    %c0_i32_43 = arith.constant 0 : i32
    %75 = tpu.memref_slice %arg11[%c10_i32_42, %c0_i32_43] : memref<16x768xf32, #tpu.memory_space<vmem>> -> memref<1x768xf32, #tpu.memory_space<vmem>>
    %76 = tpu.memref_slice %arg12[%c0_i32_40] : memref<1x!tpu.dma_semaphore, #tpu.memory_space<semaphore_mem>> -> memref<1x!tpu.dma_semaphore, #tpu.memory_space<semaphore_mem>>
    %77 = tpu.memref_squeeze %76 : memref<1x!tpu.dma_semaphore, #tpu.memory_space<semaphore_mem>> -> memref<!tpu.dma_semaphore, #tpu.memory_space<semaphore_mem>>
    tpu.enqueue_dma source(%74 : memref<1x768xf32, #tpu.memory_space<any>>) target(%75 : memref<1x768xf32, #tpu.memory_space<vmem>>) target_semaphore(%77 : memref<!tpu.dma_semaphore, #tpu.memory_space<semaphore_mem>>)
    %c11_i32 = arith.constant 11 : i32
    %78 = arith.addi %0, %c11_i32 : i32
    %79 = arith.index_cast %78 : i32 to index
    %80 = memref.load %arg1[%79] : memref<16xi32, #tpu.memory_space<smem>>
    %c0_i32_44 = arith.constant 0 : i32
    %c0_i32_45 = arith.constant 0 : i32
    %81 = tpu.memref_slice %arg3[%80, %c0_i32_45] : memref<128x768xf32, #tpu.memory_space<any>> -> memref<1x768xf32, #tpu.memory_space<any>>
    %c11_i32_46 = arith.constant 11 : i32
    %c0_i32_47 = arith.constant 0 : i32
    %82 = tpu.memref_slice %arg11[%c11_i32_46, %c0_i32_47] : memref<16x768xf32, #tpu.memory_space<vmem>> -> memref<1x768xf32, #tpu.memory_space<vmem>>
    %83 = tpu.memref_slice %arg12[%c0_i32_44] : memref<1x!tpu.dma_semaphore, #tpu.memory_space<semaphore_mem>> -> memref<1x!tpu.dma_semaphore, #tpu.memory_space<semaphore_mem>>
    %84 = tpu.memref_squeeze %83 : memref<1x!tpu.dma_semaphore, #tpu.memory_space<semaphore_mem>> -> memref<!tpu.dma_semaphore, #tpu.memory_space<semaphore_mem>>
    tpu.enqueue_dma source(%81 : memref<1x768xf32, #tpu.memory_space<any>>) target(%82 : memref<1x768xf32, #tpu.memory_space<vmem>>) target_semaphore(%84 : memref<!tpu.dma_semaphore, #tpu.memory_space<semaphore_mem>>)
    %c12_i32 = arith.constant 12 : i32
    %85 = arith.addi %0, %c12_i32 : i32
    %86 = arith.index_cast %85 : i32 to index
    %87 = memref.load %arg1[%86] : memref<16xi32, #tpu.memory_space<smem>>
    %c0_i32_48 = arith.constant 0 : i32
    %c0_i32_49 = arith.constant 0 : i32
    %88 = tpu.memref_slice %arg3[%87, %c0_i32_49] : memref<128x768xf32, #tpu.memory_space<any>> -> memref<1x768xf32, #tpu.memory_space<any>>
    %c12_i32_50 = arith.constant 12 : i32
    %c0_i32_51 = arith.constant 0 : i32
    %89 = tpu.memref_slice %arg11[%c12_i32_50, %c0_i32_51] : memref<16x768xf32, #tpu.memory_space<vmem>> -> memref<1x768xf32, #tpu.memory_space<vmem>>
    %90 = tpu.memref_slice %arg12[%c0_i32_48] : memref<1x!tpu.dma_semaphore, #tpu.memory_space<semaphore_mem>> -> memref<1x!tpu.dma_semaphore, #tpu.memory_space<semaphore_mem>>
    %91 = tpu.memref_squeeze %90 : memref<1x!tpu.dma_semaphore, #tpu.memory_space<semaphore_mem>> -> memref<!tpu.dma_semaphore, #tpu.memory_space<semaphore_mem>>
    tpu.enqueue_dma source(%88 : memref<1x768xf32, #tpu.memory_space<any>>) target(%89 : memref<1x768xf32, #tpu.memory_space<vmem>>) target_semaphore(%91 : memref<!tpu.dma_semaphore, #tpu.memory_space<semaphore_mem>>)
    %c13_i32 = arith.constant 13 : i32
    %92 = arith.addi %0, %c13_i32 : i32
    %93 = arith.index_cast %92 : i32 to index
    %94 = memref.load %arg1[%93] : memref<16xi32, #tpu.memory_space<smem>>
    %c0_i32_52 = arith.constant 0 : i32
    %c0_i32_53 = arith.constant 0 : i32
    %95 = tpu.memref_slice %arg3[%94, %c0_i32_53] : memref<128x768xf32, #tpu.memory_space<any>> -> memref<1x768xf32, #tpu.memory_space<any>>
    %c13_i32_54 = arith.constant 13 : i32
    %c0_i32_55 = arith.constant 0 : i32
    %96 = tpu.memref_slice %arg11[%c13_i32_54, %c0_i32_55] : memref<16x768xf32, #tpu.memory_space<vmem>> -> memref<1x768xf32, #tpu.memory_space<vmem>>
    %97 = tpu.memref_slice %arg12[%c0_i32_52] : memref<1x!tpu.dma_semaphore, #tpu.memory_space<semaphore_mem>> -> memref<1x!tpu.dma_semaphore, #tpu.memory_space<semaphore_mem>>
    %98 = tpu.memref_squeeze %97 : memref<1x!tpu.dma_semaphore, #tpu.memory_space<semaphore_mem>> -> memref<!tpu.dma_semaphore, #tpu.memory_space<semaphore_mem>>
    tpu.enqueue_dma source(%95 : memref<1x768xf32, #tpu.memory_space<any>>) target(%96 : memref<1x768xf32, #tpu.memory_space<vmem>>) target_semaphore(%98 : memref<!tpu.dma_semaphore, #tpu.memory_space<semaphore_mem>>)
    %c14_i32 = arith.constant 14 : i32
    %99 = arith.addi %0, %c14_i32 : i32
    %100 = arith.index_cast %99 : i32 to index
    %101 = memref.load %arg1[%100] : memref<16xi32, #tpu.memory_space<smem>>
    %c0_i32_56 = arith.constant 0 : i32
    %c0_i32_57 = arith.constant 0 : i32
    %102 = tpu.memref_slice %arg3[%101, %c0_i32_57] : memref<128x768xf32, #tpu.memory_space<any>> -> memref<1x768xf32, #tpu.memory_space<any>>
    %c14_i32_58 = arith.constant 14 : i32
    %c0_i32_59 = arith.constant 0 : i32
    %103 = tpu.memref_slice %arg11[%c14_i32_58, %c0_i32_59] : memref<16x768xf32, #tpu.memory_space<vmem>> -> memref<1x768xf32, #tpu.memory_space<vmem>>
    %104 = tpu.memref_slice %arg12[%c0_i32_56] : memref<1x!tpu.dma_semaphore, #tpu.memory_space<semaphore_mem>> -> memref<1x!tpu.dma_semaphore, #tpu.memory_space<semaphore_mem>>
    %105 = tpu.memref_squeeze %104 : memref<1x!tpu.dma_semaphore, #tpu.memory_space<semaphore_mem>> -> memref<!tpu.dma_semaphore, #tpu.memory_space<semaphore_mem>>
    tpu.enqueue_dma source(%102 : memref<1x768xf32, #tpu.memory_space<any>>) target(%103 : memref<1x768xf32, #tpu.memory_space<vmem>>) target_semaphore(%105 : memref<!tpu.dma_semaphore, #tpu.memory_space<semaphore_mem>>)
    %c15_i32 = arith.constant 15 : i32
    %106 = arith.addi %0, %c15_i32 : i32
    %107 = arith.index_cast %106 : i32 to index
    %108 = memref.load %arg1[%107] : memref<16xi32, #tpu.memory_space<smem>>
    %c0_i32_60 = arith.constant 0 : i32
    %c0_i32_61 = arith.constant 0 : i32
    %109 = tpu.memref_slice %arg3[%108, %c0_i32_61] : memref<128x768xf32, #tpu.memory_space<any>> -> memref<1x768xf32, #tpu.memory_space<any>>
    %c15_i32_62 = arith.constant 15 : i32
    %c0_i32_63 = arith.constant 0 : i32
    %110 = tpu.memref_slice %arg11[%c15_i32_62, %c0_i32_63] : memref<16x768xf32, #tpu.memory_space<vmem>> -> memref<1x768xf32, #tpu.memory_space<vmem>>
    %111 = tpu.memref_slice %arg12[%c0_i32_60] : memref<1x!tpu.dma_semaphore, #tpu.memory_space<semaphore_mem>> -> memref<1x!tpu.dma_semaphore, #tpu.memory_space<semaphore_mem>>
    %112 = tpu.memref_squeeze %111 : memref<1x!tpu.dma_semaphore, #tpu.memory_space<semaphore_mem>> -> memref<!tpu.dma_semaphore, #tpu.memory_space<semaphore_mem>>
    tpu.enqueue_dma source(%109 : memref<1x768xf32, #tpu.memory_space<any>>) target(%110 : memref<1x768xf32, #tpu.memory_space<vmem>>) target_semaphore(%112 : memref<!tpu.dma_semaphore, #tpu.memory_space<semaphore_mem>>)
    %c0_i32_64 = arith.constant 0 : i32
    %c16_i32_65 = arith.constant 16 : i32
    %113 = arith.addi %c0_i32_64, %c16_i32_65 : i32
    %c1_i32_66 = arith.constant 1 : i32
    scf.for %arg13 = %c0_i32_64 to %113 step %c1_i32_66  : i32 {
      %c0_i32_88 = arith.constant 0 : i32
      %c0_i32_89 = arith.constant 0 : i32
      %c0_i32_90 = arith.constant 0 : i32
      %142 = tpu.memref_slice %arg3[%c0_i32_89, %c0_i32_90] : memref<128x768xf32, #tpu.memory_space<any>> -> memref<1x768xf32, #tpu.memory_space<any>>
      %c0_i32_91 = arith.constant 0 : i32
      %c0_i32_92 = arith.constant 0 : i32
      %143 = tpu.memref_slice %arg11[%c0_i32_91, %c0_i32_92] : memref<16x768xf32, #tpu.memory_space<vmem>> -> memref<1x768xf32, #tpu.memory_space<vmem>>
      %144 = tpu.memref_slice %arg12[%c0_i32_88] : memref<1x!tpu.dma_semaphore, #tpu.memory_space<semaphore_mem>> -> memref<1x!tpu.dma_semaphore, #tpu.memory_space<semaphore_mem>>
      %145 = tpu.memref_squeeze %144 : memref<1x!tpu.dma_semaphore, #tpu.memory_space<semaphore_mem>> -> memref<!tpu.dma_semaphore, #tpu.memory_space<semaphore_mem>>
      tpu.wait_dma2 semaphore(%145 : memref<!tpu.dma_semaphore, #tpu.memory_space<semaphore_mem>>) src(%142 : memref<1x768xf32, #tpu.memory_space<any>>) dst(%143 : memref<1x768xf32, #tpu.memory_space<vmem>>)
    }
    %c0 = arith.constant 0 : index
    %c0_67 = arith.constant 0 : index
    %114 = vector.load %arg11[%c0, %c0_67] : memref<16x768xf32, #tpu.memory_space<vmem>>, vector<16x768xf32>
    %115 = arith.truncf %114 : vector<16x768xf32> to vector<16x768xbf16>
    %c0_68 = arith.constant 0 : index
    %c0_69 = arith.constant 0 : index
    %116 = vector.load %arg2[%c0_68, %c0_69] : memref<16x1xf32, #tpu.memory_space<vmem>>, vector<16x1xf32>
    %c0_70 = arith.constant 0 : index
    %c0_71 = arith.constant 0 : index
    %117 = vector.load %arg4[%c0_70, %c0_71] : memref<768x64xbf16, #tpu.memory_space<vmem>>, vector<768x64xbf16>
    %cst = arith.constant dense<0.000000e+00> : vector<16x64xf32>
    %118 = tpu.matmul %115, %117, %cst {dimension_numbers = #tpu.dot_dimension_numbers<[1], [0], [0], [1], [0, 0, 1, 1], [], []>} : vector<16x768xbf16>, vector<768x64xbf16>, vector<16x64xf32> -> vector<16x64xf32>
    %c0_72 = arith.constant 0 : index
    %c0_73 = arith.constant 0 : index
    %119 = vector.load %arg5[%c0_72, %c0_73] : memref<1x64xf32, #tpu.memory_space<vmem>>, vector<1x64xf32>
    %120 = vector.broadcast %119 : vector<1x64xf32> to vector<16x64xf32>
    %121 = arith.addf %118, %120 : vector<16x64xf32>
    %cst_74 = arith.constant 0.000000e+00 : f32
    %122 = vector.broadcast %cst_74 : f32 to vector<16x64xf32>
    %123 = arith.maximumf %121, %122 : vector<16x64xf32>
    %124 = arith.truncf %123 : vector<16x64xf32> to vector<16x64xbf16>
    %c0_75 = arith.constant 0 : index
    %c0_76 = arith.constant 0 : index
    %125 = vector.load %arg6[%c0_75, %c0_76] : memref<64x64xbf16, #tpu.memory_space<vmem>>, vector<64x64xbf16>
    %cst_77 = arith.constant dense<0.000000e+00> : vector<16x64xf32>
    %126 = tpu.matmul %124, %125, %cst_77 {dimension_numbers = #tpu.dot_dimension_numbers<[1], [0], [0], [1], [0, 0, 1, 1], [], []>} : vector<16x64xbf16>, vector<64x64xbf16>, vector<16x64xf32> -> vector<16x64xf32>
    %c0_78 = arith.constant 0 : index
    %c0_79 = arith.constant 0 : index
    %127 = vector.load %arg7[%c0_78, %c0_79] : memref<1x64xf32, #tpu.memory_space<vmem>>, vector<1x64xf32>
    %128 = vector.broadcast %127 : vector<1x64xf32> to vector<16x64xf32>
    %129 = arith.addf %126, %128 : vector<16x64xf32>
    %cst_80 = arith.constant 0.000000e+00 : f32
    %130 = vector.broadcast %cst_80 : f32 to vector<16x64xf32>
    %131 = arith.maximumf %129, %130 : vector<16x64xf32>
    %c0_81 = arith.constant 0 : index
    %c0_82 = arith.constant 0 : index
    %132 = vector.load %arg8[%c0_81, %c0_82] : memref<1x64xf32, #tpu.memory_space<vmem>>, vector<1x64xf32>
    %133 = vector.broadcast %132 : vector<1x64xf32> to vector<16x64xf32>
    %134 = arith.mulf %131, %133 : vector<16x64xf32>
    %cst_83 = arith.constant dense<0.000000e+00> : vector<16xf32>
    %135 = vector.multi_reduction <add>, %134, %cst_83 [1] : vector<16x64xf32> to vector<16xf32>
    %136 = vector.shape_cast %135 : vector<16xf32> to vector<16x1xf32>
    %c0_84 = arith.constant 0 : index
    %c0_85 = arith.constant 0 : index
    %137 = vector.load %arg9[%c0_84, %c0_85] : memref<1x1xf32, #tpu.memory_space<vmem>>, vector<1x1xf32>
    %138 = vector.broadcast %137 : vector<1x1xf32> to vector<16x1xf32>
    %139 = arith.addf %136, %138 : vector<16x1xf32>
    %140 = arith.mulf %139, %116 : vector<16x1xf32>
    %c0_86 = arith.constant 0 : index
    %c0_87 = arith.constant 0 : index
    %141 = vector.load %arg10[%c0_86, %c0_87] : memref<16x1xf32, #tpu.memory_space<vmem>>, vector<16x1xf32>
    tpu.vector_store %arg10[%c0_86, %c0_87], %140 {strides = array<i32>} : memref<16x1xf32, #tpu.memory_space<vmem>>, vector<16x1xf32>,
    return
  }
  func.func @transform_0(%arg0: i32, %arg1: memref<16xi32, #tpu.memory_space<smem>>) -> (i32, i32) {
    %c0_i32 = arith.constant 0 : i32
    %c0_i32_0 = arith.constant 0 : i32
    return %arg0, %c0_i32 : i32, i32
  }
  func.func @transform_2(%arg0: i32, %arg1: memref<16xi32, #tpu.memory_space<smem>>) -> (i32, i32) {
    %c0_i32 = arith.constant 0 : i32
    %c0_i32_0 = arith.constant 0 : i32
    %c0_i32_1 = arith.constant 0 : i32
    return %c0_i32, %c0_i32_0 : i32, i32
  }
  func.func @transform_3(%arg0: i32, %arg1: memref<16xi32, #tpu.memory_space<smem>>) -> (i32, i32) {
    %c0_i32 = arith.constant 0 : i32
    %c0_i32_0 = arith.constant 0 : i32
    %c0_i32_1 = arith.constant 0 : i32
    return %c0_i32, %c0_i32_0 : i32, i32
  }
  func.func @transform_4(%arg0: i32, %arg1: memref<16xi32, #tpu.memory_space<smem>>) -> (i32, i32) {
    %c0_i32 = arith.constant 0 : i32
    %c0_i32_0 = arith.constant 0 : i32
    %c0_i32_1 = arith.constant 0 : i32
    return %c0_i32, %c0_i32_0 : i32, i32
  }
  func.func @transform_5(%arg0: i32, %arg1: memref<16xi32, #tpu.memory_space<smem>>) -> (i32, i32) {
    %c0_i32 = arith.constant 0 : i32
    %c0_i32_0 = arith.constant 0 : i32
    %c0_i32_1 = arith.constant 0 : i32
    return %c0_i32, %c0_i32_0 : i32, i32
  }
  func.func @transform_6(%arg0: i32, %arg1: memref<16xi32, #tpu.memory_space<smem>>) -> (i32, i32) {
    %c0_i32 = arith.constant 0 : i32
    %c0_i32_0 = arith.constant 0 : i32
    %c0_i32_1 = arith.constant 0 : i32
    return %c0_i32, %c0_i32_0 : i32, i32
  }
  func.func @transform_7(%arg0: i32, %arg1: memref<16xi32, #tpu.memory_space<smem>>) -> (i32, i32) {
    %c0_i32 = arith.constant 0 : i32
    %c0_i32_0 = arith.constant 0 : i32
    %c0_i32_1 = arith.constant 0 : i32
    return %c0_i32, %c0_i32_0 : i32, i32
  }
  func.func @transform_8(%arg0: i32, %arg1: memref<16xi32, #tpu.memory_space<smem>>) -> (i32, i32) {
    %c0_i32 = arith.constant 0 : i32
    %c0_i32_0 = arith.constant 0 : i32
    return %arg0, %c0_i32 : i32, i32
  }
}

</mosaic_0001>

<bundles_post_ra>
// kernel: tpu_custom_call.1
= control target key start
LH: loop header
LB: loop body
LE: loop exit
PB: predicated region body
PF: predicated region fallthrough
CT: control target
= control target key end

     0   :  { %s2191_s0 = inlined_call_operand.vmem [shape: s32[16], index: 0, kind: input, shape index: {}]   ;;  %s2192_s1 = inlined_call_operand.vmem [shape: f32[16,1], index: 1, kind: input, shape index: {}]   ;;  %s2193_s2 = inlined_call_operand.hbm [shape: f32[128,768], index: 2, kind: input, shape index: {}]   ;;  %s2194_s3 = inlined_call_operand.vmem [shape: bf16[768,64], index: 3, kind: input, shape index: {}]   ;;  %s2195_s4 = inlined_call_operand.vmem [shape: f32[1,64], index: 4, kind: input, shape index: {}]   ;;  %s2196_s5 = inlined_call_operand.vmem [shape: bf16[64,64], index: 5, kind: input, shape index: {}]   ;;  %s2197_s6 = inlined_call_operand.vmem [shape: f32[1,64], index: 6, kind: input, shape index: {}]   ;;  %s2198_s7 = inlined_call_operand.vmem [shape: f32[1,64], index: 7, kind: input, shape index: {}]   ;;  %s2199_s9 = inlined_call_operand.vmem [shape: f32[16,1], index: 9, kind: output, shape index: {}]   ;;  %s2200_s8 = inlined_call_operand.<no memory space> [shape: f32[1,1], index: 8, kind: input, shape index: {}]  }
   0x1   :  { %2208 = sst [smem:[#allocation25_spill]] %s2192_s1  ;;  %s14_s11 = sshll.u32 %s2191_s0, 4  ;;  %v18_v0 = vstv %s2200_s8  ;;  %s15_s11 = int_to_ptr.vmem [resolvable:$true] %s14_s11 }
   0x2   :  { %2209 = sst [smem:[#allocation26_spill]] %s2195_s4  ;;  %19 = vst [vmem:[#allocation6] sm:$0x1] %v18_v0  ;;  %s1253_s14 = scalar_lea.vmem %s15_s11, 16 }
   0x3   :  { %2210 = sst [smem:[#allocation27_spill]] %s2196_s5  ;;  %p1254_p0 = scmp.ne.s32.totalorder %s15_s11, %s1253_s14 }
   0x4   :  { %2211 = sst [smem:[#allocation28_spill]] %s2197_s6  ;;  %p1258_p1 = scmp.lt.s32.totalorder %s15_s11, %s15_s11 }
   0x5   :  { %2212 = sst [smem:[#allocation29_spill]] %s2198_s7  ;;  %p1259_p2 = scmp.lt.s32.totalorder %s1253_s14, %s1253_s14 }
   0x6   :  { %2213 = sst [smem:[#allocation30_spill]] %s2199_s9 }
   0x7   :  { %p1260_p3 = por %p1259_p2, %p1258_p1 }
   0x9   :  { %p1261_p4 = pnand %p1260_p3, %p1254_p0 }
   0xb   :  { %1264 = shalt.err (!%p1261_p4)  }
   0xc   :  { %s1629_s15 = smov [#allocation5]  }
   0xd   :  { %17 = dma.vmem_to_smem %s15_s11, 16, %s1629_s15, [#allocation4] }
   0xe   :  { %1621 = dma.done.wait [#allocation4], 16 }
   0xf   :  { %1622 = vsyncadd [#allocation4], 4294967280 }
  0x10   :  { %21 = sfence }
  0x11   :  { %s38_s16 = sld [smem:[#allocation5]]  ;;  %s1630_s0 = smov [#allocation2]  }
  0x12   :  { %s46_s17 = sshll.u32 %s1630_s0, 4  ;;  %s1708_s8 = sld [smem:[#allocation5 + $0x1]]  ;;  %s1706_s17 = int_to_ptr.vmem [resolvable:$true] %s46_s17 }
  0x13   :  { %s1631_s18 = smov [#allocation2 + $0x1]   ;;  %s1710_s20 = sld [smem:[#allocation5 + $0x2]] }
  0x14   :  { %s60_s19 = sshll.u32 %s1631_s18, 4  ;;  %s1632_s24 = smov [#allocation2 + $0x2]   ;;  %s1712_s19 = int_to_ptr.vmem [resolvable:$true] %s60_s19 }
  0x15   :  { %s74_s25 = sshll.u32 %s1632_s24, 4  ;;  %s1716_s26 = sld [smem:[#allocation5 + $0x3]]  ;;  %s1714_s25 = int_to_ptr.vmem [resolvable:$true] %s74_s25 }
  0x16   :  { %s1726_s0 = scalar_lea.hbm %s2193_s2, 12288 }
  0x17   :  { %s39_s21 = sshrl.u32 %s38_s16, 3  ;;  %s40_s22 = sand.u32 7, %s38_s16  }
  0x18   :  { %s41_s23 = smul.u32 48, %s39_s21  ;;  %s52_s28 = sshrl.u32 %s1708_s8, 3 }
  0x19   :  { %s53_s30 = sand.u32 7, %s1708_s8   ;;  %s54_s13 = smul.u32 48, %s52_s28 }
  0x1a   :  { %s42_s27 = sadd.s32 %s41_s23, %s40_s22 }
  0x1b   :  { %s1000_s29 = sshll.u32 %s42_s27, 4 }
  0x1c   :  { %s44_s12 = scalar_lea.hbm %s2193_s2, %s1000_s29 }
  0x1d   :  { %s1265_s14 = scalar_lea.hbm %s44_s12, 96  ;;  %p1268_p6 = scmp.lt.s32.totalorder %s44_s12, %s2193_s2 }
  0x1e   :  { %p1266_p5 = scmp.ne.s32.totalorder %s44_s12, %s1265_s14  ;;  %p1269_p7 = scmp.lt.s32.totalorder %s1726_s0, %s1265_s14 }
  0x20   :  { %p1270_p8 = por %p1269_p7, %p1268_p6 }
  0x22   :  { %p1271_p9 = pnand %p1270_p8, %p1266_p5 }
  0x24   :  { %1274 = shalt.err (!%p1271_p9)  }
  0x25   :  { %s1275_s8 = scalar_lea.vmem %s1706_s17, 96  ;;  %s1735_s22 = scalar_lea.vmem %s1706_s17, 1536 }
  0x26   :  { %p1276_p10 = scmp.ne.s32.totalorder %s1706_s17, %s1275_s8  ;;  %p1280_p11 = scmp.lt.s32.totalorder %s1706_s17, %s1706_s17 }
  0x27   :  { %p1281_p12 = scmp.lt.s32.totalorder %s1735_s22, %s1275_s8 }
  0x29   :  { %p1282_p13 = por %p1281_p12, %p1280_p11 }
  0x2b   :  { %p1283_p0 = pnand %p1282_p13, %p1276_p10 }
  0x2d   :  { %1286 = shalt.err (!%p1283_p0)  }
  0x2e   :  { %s2201_s23 = smov 128   ;;  %s2203_s24 = smov 1  }
  0x2f   :  { %49 = dma.hbm_to_vmem [thread:$0]  %s44_s12, 96, %s1706_s17, [#allocation3], %s2201_s23, %s2201_s23, %s2203_s24 }
  0x30   :  { %s55_s27 = sadd.s32 %s54_s13, %s53_s30  ;;  %s66_s28 = sshrl.u32 %s1710_s20, 3 }
  0x31   :  { %s1002_s29 = sshll.u32 %s55_s27, 4  ;;  %s67_s10 = sand.u32 7, %s1710_s20  }
  0x32   :  { %s57_s15 = scalar_lea.hbm %s2193_s2, %s1002_s29  ;;  %s68_s16 = smul.u32 48, %s66_s28 }
  0x33   :  { %s1287_s18 = scalar_lea.hbm %s57_s15, 96  ;;  %p1290_p2 = scmp.lt.s32.totalorder %s57_s15, %s2193_s2 }
  0x34   :  { %p1288_p1 = scmp.ne.s32.totalorder %s57_s15, %s1287_s18  ;;  %p1291_p3 = scmp.lt.s32.totalorder %s1726_s0, %s1287_s18 }
  0x36   :  { %p1292_p4 = por %p1291_p3, %p1290_p2 }
  0x38   :  { %p1293_p5 = pnand %p1292_p4, %p1288_p1 }
  0x3a   :  { %1296 = shalt.err (!%p1293_p5)  }
  0x3b   :  { %s1297_s20 = scalar_lea.vmem %s1712_s19, 96  ;;  %p1302_p7 = scmp.lt.s32.totalorder %s1712_s19, %s1706_s17 }
  0x3c   :  { %p1298_p6 = scmp.ne.s32.totalorder %s1712_s19, %s1297_s20  ;;  %p1303_p8 = scmp.lt.s32.totalorder %s1735_s22, %s1297_s20 }
  0x3e   :  { %p1304_p9 = por %p1303_p8, %p1302_p7 }
  0x40   :  { %p1305_p10 = pnand %p1304_p9, %p1298_p6 }
  0x42   :  { %1308 = shalt.err (!%p1305_p10)  }
  0x43   :  { %63 = dma.hbm_to_vmem [thread:$0]  %s57_s15, 96, %s1712_s19, [#allocation3], %s2201_s23, %s2201_s23, %s2203_s24 }
  0x44   :  { %s69_s30 = sadd.s32 %s68_s16, %s67_s10  ;;  %s80_s12 = sshrl.u32 %s1716_s26, 3 }
  0x45   :  { %s1004_s13 = sshll.u32 %s69_s30, 4  ;;  %s81_s27 = sand.u32 7, %s1716_s26  }
  0x46   :  { %s71_s11 = scalar_lea.hbm %s2193_s2, %s1004_s13  ;;  %s82_s14 = smul.u32 48, %s80_s12 }
  0x47   :  { %s1309_s18 = scalar_lea.hbm %s71_s11, 96  ;;  %p1312_p12 = scmp.lt.s32.totalorder %s71_s11, %s2193_s2 }
  0x48   :  { %p1310_p11 = scmp.ne.s32.totalorder %s71_s11, %s1309_s18  ;;  %p1313_p13 = scmp.lt.s32.totalorder %s1726_s0, %s1309_s18 }
  0x4a   :  { %p1314_p0 = por %p1313_p13, %p1312_p12 }
  0x4c   :  { %p1315_p1 = pnand %p1314_p0, %p1310_p11 }
  0x4e   :  { %1318 = shalt.err (!%p1315_p1)  }
  0x4f   :  { %s1319_s19 = scalar_lea.vmem %s1714_s25, 96  ;;  %p1324_p3 = scmp.lt.s32.totalorder %s1714_s25, %s1706_s17 }
  0x50   :  { %p1320_p2 = scmp.ne.s32.totalorder %s1714_s25, %s1319_s19  ;;  %p1325_p4 = scmp.lt.s32.totalorder %s1735_s22, %s1319_s19 }
  0x52   :  { %p1326_p5 = por %p1325_p4, %p1324_p3 }
  0x54   :  { %p1327_p6 = pnand %p1326_p5, %p1320_p2 }
  0x56   :  { %1330 = shalt.err (!%p1327_p6)  }
  0x57   :  { %77 = dma.hbm_to_vmem [thread:$0]  %s71_s11, 96, %s1714_s25, [#allocation3], %s2201_s23, %s2201_s23, %s2203_s24 }
  0x58   :  { %s83_s26 = sadd.s32 %s82_s14, %s81_s27  ;;  %s1635_s15 = smov [#allocation2 + $0x3]  }
  0x59   :  { %s1006_s10 = sshll.u32 %s83_s26, 4  ;;  %s88_s16 = sshll.u32 %s1635_s15, 4  ;;  %s89_s16 = int_to_ptr.vmem [resolvable:$true] %s88_s16 }
  0x5a   :  { %s85_s12 = scalar_lea.hbm %s2193_s2, %s1006_s10 }
  0x5b   :  { %s1331_s13 = scalar_lea.hbm %s85_s12, 96  ;;  %p1334_p8 = scmp.lt.s32.totalorder %s85_s12, %s2193_s2 }
  0x5c   :  { %p1332_p7 = scmp.ne.s32.totalorder %s85_s12, %s1331_s13  ;;  %p1335_p9 = scmp.lt.s32.totalorder %s1726_s0, %s1331_s13 }
  0x5e   :  { %p1336_p10 = por %p1335_p9, %p1334_p8 }
  0x60   :  { %p1337_p11 = pnand %p1336_p10, %p1332_p7 }
  0x62   :  { %1340 = shalt.err (!%p1337_p11)  }
  0x63   :  { %s1341_s25 = scalar_lea.vmem %s89_s16, 96  ;;  %p1346_p13 = scmp.lt.s32.totalorder %s89_s16, %s1706_s17 }
  0x64   :  { %p1342_p12 = scmp.ne.s32.totalorder %s89_s16, %s1341_s25  ;;  %p1347_p0 = scmp.lt.s32.totalorder %s1735_s22, %s1341_s25 }
  0x66   :  { %p1348_p1 = por %p1347_p0, %p1346_p13 }
  0x68   :  { %p1349_p2 = pnand %p1348_p1, %p1342_p12 }
  0x6a   :  { %1352 = shalt.err (!%p1349_p2)  }
  0x6b   :  { %91 = dma.hbm_to_vmem [thread:$0]  %s85_s12, 96, %s89_s16, [#allocation3], %s2201_s23, %s2201_s23, %s2203_s24 }
  0x6c   :  { %s1007_s27 = sld [smem:[#allocation5 + $0x4]]  ;;  %s1636_s11 = smov [#allocation2 + $0x4]  }
  0x6d   :  { %s102_s14 = sshll.u32 %s1636_s11, 4  ;;  %s1009_s18 = sld [smem:[#allocation5 + $0x5]]  ;;  %s1792_s14 = int_to_ptr.vmem [resolvable:$true] %s102_s14 }
  0x6e   :  { %s1637_s21 = smov [#allocation2 + $0x5]   ;;  %s1794_s19 = sld [smem:[#allocation5 + $0x6]] }
  0x6f   :  { %s116_s8 = sshll.u32 %s1637_s21, 4  ;;  %s1638_s26 = smov [#allocation2 + $0x6]   ;;  %s1796_s8 = int_to_ptr.vmem [resolvable:$true] %s116_s8 }
  0x70   :  { %s1798_s10 = sshll.u32 %s1638_s26, 4  ;;  %s1800_s15 = sld [smem:[#allocation5 + $0x7]]  ;;  %s131_s10 = int_to_ptr.vmem [resolvable:$true] %s1798_s10 }
  0x72   :  { %s94_s16 = sshrl.u32 %s1007_s27, 3  ;;  %s95_s20 = sand.u32 7, %s1007_s27  }
  0x73   :  { %s96_s30 = smul.u32 48, %s94_s16  ;;  %s108_s12 = sshrl.u32 %s1009_s18, 3 }
  0x74   :  { %s109_s13 = sand.u32 7, %s1009_s18   ;;  %s110_s28 = smul.u32 48, %s108_s12 }
  0x75   :  { %s97_s29 = sadd.s32 %s96_s30, %s95_s20  ;;  %s122_s25 = sshrl.u32 %s1794_s19, 3 }
  0x76   :  { %s1008_s11 = sshll.u32 %s97_s29, 4  ;;  %s111_s21 = sadd.s32 %s110_s28, %s109_s13 }
  0x77   :  { %s99_s9 = scalar_lea.hbm %s2193_s2, %s1008_s11  ;;  %s1010_s1 = sshll.u32 %s111_s21, 4 }
  0x78   :  { %s1353_s26 = scalar_lea.hbm %s99_s9, 96  ;;  %p1356_p4 = scmp.lt.s32.totalorder %s99_s9, %s2193_s2 }
  0x79   :  { %p1354_p3 = scmp.ne.s32.totalorder %s99_s9, %s1353_s26  ;;  %p1357_p5 = scmp.lt.s32.totalorder %s1726_s0, %s1353_s26 }
  0x7b   :  { %p1358_p6 = por %p1357_p5, %p1356_p4 }
  0x7d   :  { %p1359_p7 = pnand %p1358_p6, %p1354_p3 }
  0x7f   :  { %1362 = shalt.err (!%p1359_p7)  }
  0x80   :  { %s1363_s27 = scalar_lea.vmem %s1792_s14, 96  ;;  %p1368_p9 = scmp.lt.s32.totalorder %s1792_s14, %s1706_s17 }
  0x81   :  { %p1364_p8 = scmp.ne.s32.totalorder %s1792_s14, %s1363_s27  ;;  %p1369_p10 = scmp.lt.s32.totalorder %s1735_s22, %s1363_s27 }
  0x83   :  { %p1370_p11 = por %p1369_p10, %p1368_p9 }
  0x85   :  { %p1371_p12 = pnand %p1370_p11, %p1364_p8 }
  0x87   :  { %1374 = shalt.err (!%p1371_p12)  }
  0x88   :  { %s2214_s23 = smov 1   ;;  %s2215_s24 = smov 128  }
  0x89   :  { %105 = dma.hbm_to_vmem [thread:$0]  %s99_s9, 96, %s1792_s14, [#allocation3], %s2215_s24, %s2215_s24, %s2214_s23 }
  0x8a   :  { %s113_s18 = scalar_lea.hbm %s2193_s2, %s1010_s1  ;;  %s123_s16 = sand.u32 7, %s1794_s19  }
  0x8b   :  { %s1375_s20 = scalar_lea.hbm %s113_s18, 96  ;;  %p1378_p0 = scmp.lt.s32.totalorder %s113_s18, %s2193_s2 }
  0x8c   :  { %p1376_p13 = scmp.ne.s32.totalorder %s113_s18, %s1375_s20  ;;  %p1379_p1 = scmp.lt.s32.totalorder %s1726_s0, %s1375_s20 }
  0x8e   :  { %p1380_p2 = por %p1379_p1, %p1378_p0 }
  0x90   :  { %p1381_p3 = pnand %p1380_p2, %p1376_p13 }
  0x92   :  { %1384 = shalt.err (!%p1381_p3)  }
  0x93   :  { %s1385_s9 = scalar_lea.vmem %s1796_s8, 96  ;;  %p1390_p5 = scmp.lt.s32.totalorder %s1796_s8, %s1706_s17 }
  0x94   :  { %p1386_p4 = scmp.ne.s32.totalorder %s1796_s8, %s1385_s9  ;;  %p1391_p6 = scmp.lt.s32.totalorder %s1735_s22, %s1385_s9 }
  0x96   :  { %p1392_p7 = por %p1391_p6, %p1390_p5 }
  0x98   :  { %p1393_p8 = pnand %p1392_p7, %p1386_p4 }
  0x9a   :  { %1396 = shalt.err (!%p1393_p8)  }
  0x9b   :  { %119 = dma.hbm_to_vmem [thread:$0]  %s113_s18, 96, %s1796_s8, [#allocation3], %s2215_s24, %s2215_s24, %s2214_s23 }
  0x9c   :  { %s124_s1 = smul.u32 48, %s122_s25  ;;  %s136_s14 = sshrl.u32 %s1800_s15, 3 }
  0x9d   :  { %s137_s13 = sand.u32 7, %s1800_s15   ;;  %s138_s29 = smul.u32 48, %s136_s14 }
  0x9e   :  { %s125_s28 = sadd.s32 %s124_s1, %s123_s16 }
  0x9f   :  { %s1012_s11 = sshll.u32 %s125_s28, 4  ;;  %s139_s6 = sadd.s32 %s138_s29, %s137_s13 }
  0xa0   :  { %s127_s27 = scalar_lea.hbm %s2193_s2, %s1012_s11 }
  0xa1   :  { %s1397_s7 = scalar_lea.hbm %s127_s27, 96  ;;  %p1400_p10 = scmp.lt.s32.totalorder %s127_s27, %s2193_s2 }
  0xa2   :  { %p1398_p9 = scmp.ne.s32.totalorder %s127_s27, %s1397_s7  ;;  %p1401_p11 = scmp.lt.s32.totalorder %s1726_s0, %s1397_s7 }
  0xa4   :  { %p1402_p12 = por %p1401_p11, %p1400_p10 }
  0xa6   :  { %p1403_p13 = pnand %p1402_p12, %p1398_p9 }
  0xa8   :  { %1406 = shalt.err (!%p1403_p13)  }
  0xa9   :  { %s1407_s8 = scalar_lea.vmem %s131_s10, 96  ;;  %p1412_p1 = scmp.lt.s32.totalorder %s131_s10, %s1706_s17 }
  0xaa   :  { %p1408_p0 = scmp.ne.s32.totalorder %s131_s10, %s1407_s8  ;;  %p1413_p2 = scmp.lt.s32.totalorder %s1735_s22, %s1407_s8 }
  0xac   :  { %p1414_p3 = por %p1413_p2, %p1412_p1 }
  0xae   :  { %p1415_p4 = pnand %p1414_p3, %p1408_p0 }
  0xb0   :  { %1418 = shalt.err (!%p1415_p4)  }
  0xb1   :  { %133 = dma.hbm_to_vmem [thread:$0]  %s127_s27, 96, %s131_s10, [#allocation3], %s2215_s24, %s2215_s24, %s2214_s23 }
  0xb2   :  { %s1014_s19 = sshll.u32 %s139_s6, 4  ;;  %s1639_s15 = smov [#allocation2 + $0x7]  }
  0xb3   :  { %s144_s25 = sshll.u32 %s1639_s15, 4  ;;  %s141_s12 = scalar_lea.hbm %s2193_s2, %s1014_s19  ;;  %s145_s25 = int_to_ptr.vmem [resolvable:$true] %s144_s25 }
  0xb4   :  { %s1419_s9 = scalar_lea.hbm %s141_s12, 96  ;;  %p1422_p6 = scmp.lt.s32.totalorder %s141_s12, %s2193_s2 }
  0xb5   :  { %p1420_p5 = scmp.ne.s32.totalorder %s141_s12, %s1419_s9  ;;  %p1423_p7 = scmp.lt.s32.totalorder %s1726_s0, %s1419_s9 }
  0xb7   :  { %p1424_p8 = por %p1423_p7, %p1422_p6 }
  0xb9   :  { %p1425_p9 = pnand %p1424_p8, %p1420_p5 }
  0xbb   :  { %1428 = shalt.err (!%p1425_p9)  }
  0xbc   :  { %s1429_s13 = scalar_lea.vmem %s145_s25, 96  ;;  %p1434_p11 = scmp.lt.s32.totalorder %s145_s25, %s1706_s17 }
  0xbd   :  { %p1430_p10 = scmp.ne.s32.totalorder %s145_s25, %s1429_s13  ;;  %p1435_p12 = scmp.lt.s32.totalorder %s1735_s22, %s1429_s13 }
  0xbf   :  { %p1436_p13 = por %p1435_p12, %p1434_p11 }
  0xc1   :  { %p1437_p0 = pnand %p1436_p13, %p1430_p10 }
  0xc3   :  { %1440 = shalt.err (!%p1437_p0)  }
  0xc4   :  { %147 = dma.hbm_to_vmem [thread:$0]  %s141_s12, 96, %s145_s25, [#allocation3], %s2215_s24, %s2215_s24, %s2214_s23 }
  0xc5   :  { %s1015_s10 = sld [smem:[#allocation5 + $0x8]]  ;;  %s1640_s28 = smov [#allocation2 + $0x30]  }
  0xc6   :  { %s158_s29 = sshll.u32 %s1640_s28, 4  ;;  %s1017_s11 = sld [smem:[#allocation5 + $0x9]]  ;;  %s1865_s29 = int_to_ptr.vmem [resolvable:$true] %s158_s29 }
  0xc7   :  { %s1641_s21 = smov [#allocation2 + $0x31]   ;;  %s1867_s27 = sld [smem:[#allocation5 + $0xa]] }
  0xc8   :  { %s172_s26 = sshll.u32 %s1641_s21, 4  ;;  %s1642_s6 = smov [#allocation2 + $0x32]   ;;  %s1869_s26 = int_to_ptr.vmem [resolvable:$true] %s172_s26 }
  0xc9   :  { %s1871_s7 = sshll.u32 %s1642_s6, 4  ;;  %s1873_s20 = sld [smem:[#allocation5 + $0xb]]  ;;  %s187_s7 = int_to_ptr.vmem [resolvable:$true] %s1871_s7 }
  0xcb   :  { %s150_s30 = sshrl.u32 %s1015_s10, 3  ;;  %s151_s8 = sand.u32 7, %s1015_s10  }
  0xcc   :  { %s152_s19 = smul.u32 48, %s150_s30  ;;  %s164_s15 = sshrl.u32 %s1017_s11, 3 }
  0xcd   :  { %s165_s25 = sand.u32 7, %s1017_s11   ;;  %s166_s18 = smul.u32 48, %s164_s15 }
  0xce   :  { %s153_s16 = sadd.s32 %s152_s19, %s151_s8  ;;  %s178_s12 = sshrl.u32 %s1867_s27, 3 }
  0xcf   :  { %s1016_s9 = sshll.u32 %s153_s16, 4  ;;  %s167_s1 = sadd.s32 %s166_s18, %s165_s25 }
  0xd0   :  { %s155_s28 = scalar_lea.hbm %s2193_s2, %s1016_s9  ;;  %s1018_s21 = sshll.u32 %s167_s1, 4 }
  0xd1   :  { %s1441_s6 = scalar_lea.hbm %s155_s28, 96  ;;  %p1444_p2 = scmp.lt.s32.totalorder %s155_s28, %s2193_s2 }
  0xd2   :  { %p1442_p1 = scmp.ne.s32.totalorder %s155_s28, %s1441_s6  ;;  %p1445_p3 = scmp.lt.s32.totalorder %s1726_s0, %s1441_s6 }
  0xd4   :  { %p1446_p4 = por %p1445_p3, %p1444_p2 }
  0xd6   :  { %p1447_p5 = pnand %p1446_p4, %p1442_p1 }
  0xd8   :  { %1450 = shalt.err (!%p1447_p5)  }
  0xd9   :  { %s1451_s10 = scalar_lea.vmem %s1865_s29, 96  ;;  %p1456_p7 = scmp.lt.s32.totalorder %s1865_s29, %s1706_s17 }
  0xda   :  { %p1452_p6 = scmp.ne.s32.totalorder %s1865_s29, %s1451_s10  ;;  %p1457_p8 = scmp.lt.s32.totalorder %s1735_s22, %s1451_s10 }
  0xdc   :  { %p1458_p9 = por %p1457_p8, %p1456_p7 }
  0xde   :  { %p1459_p10 = pnand %p1458_p9, %p1452_p6 }
  0xe0   :  { %1462 = shalt.err (!%p1459_p10)  }
  0xe1   :  { %161 = dma.hbm_to_vmem [thread:$0]  %s155_s28, 96, %s1865_s29, [#allocation3], %s2215_s24, %s2215_s24, %s2214_s23 }
  0xe2   :  { %s169_s11 = scalar_lea.hbm %s2193_s2, %s1018_s21  ;;  %s179_s30 = sand.u32 7, %s1867_s27  }
  0xe3   :  { %s1463_s8 = scalar_lea.hbm %s169_s11, 96  ;;  %p1466_p12 = scmp.lt.s32.totalorder %s169_s11, %s2193_s2 }
  0xe4   :  { %p1464_p11 = scmp.ne.s32.totalorder %s169_s11, %s1463_s8  ;;  %p1467_p13 = scmp.lt.s32.totalorder %s1726_s0, %s1463_s8 }
  0xe6   :  { %p1468_p0 = por %p1467_p13, %p1466_p12 }
  0xe8   :  { %p1469_p1 = pnand %p1468_p0, %p1464_p11 }
  0xea   :  { %1472 = shalt.err (!%p1469_p1)  }
  0xeb   :  { %s1473_s29 = scalar_lea.vmem %s1869_s26, 96  ;;  %p1478_p3 = scmp.lt.s32.totalorder %s1869_s26, %s1706_s17 }
  0xec   :  { %p1474_p2 = scmp.ne.s32.totalorder %s1869_s26, %s1473_s29  ;;  %p1479_p4 = scmp.lt.s32.totalorder %s1735_s22, %s1473_s29 }
  0xee   :  { %p1480_p5 = por %p1479_p4, %p1478_p3 }
  0xf0   :  { %p1481_p6 = pnand %p1480_p5, %p1474_p2 }
  0xf2   :  { %1484 = shalt.err (!%p1481_p6)  }
  0xf3   :  { %175 = dma.hbm_to_vmem [thread:$0]  %s169_s11, 96, %s1869_s26, [#allocation3], %s2215_s24, %s2215_s24, %s2214_s23 }
  0xf4   :  { %s180_s25 = smul.u32 48, %s178_s12  ;;  %s192_s18 = sshrl.u32 %s1873_s20, 3 }
  0xf5   :  { %s193_s16 = sand.u32 7, %s1873_s20   ;;  %s194_s1 = smul.u32 48, %s192_s18 }
  0xf6   :  { %s181_s9 = sadd.s32 %s180_s25, %s179_s30 }
  0xf7   :  { %s1020_s14 = sshll.u32 %s181_s9, 4  ;;  %s195_s6 = sadd.s32 %s194_s1, %s193_s16 }
  0xf8   :  { %s183_s21 = scalar_lea.hbm %s2193_s2, %s1020_s14 }
  0xf9   :  { %s1485_s10 = scalar_lea.hbm %s183_s21, 96  ;;  %p1488_p8 = scmp.lt.s32.totalorder %s183_s21, %s2193_s2 }
  0xfa   :  { %p1486_p7 = scmp.ne.s32.totalorder %s183_s21, %s1485_s10  ;;  %p1489_p9 = scmp.lt.s32.totalorder %s1726_s0, %s1485_s10 }
  0xfc   :  { %p1490_p10 = por %p1489_p9, %p1488_p8 }
  0xfe   :  { %p1491_p11 = pnand %p1490_p10, %p1486_p7 }
 0x100   :  { %1494 = shalt.err (!%p1491_p11)  }
 0x101   :  { %s1495_s26 = scalar_lea.vmem %s187_s7, 96  ;;  %p1500_p13 = scmp.lt.s32.totalorder %s187_s7, %s1706_s17 }
 0x102   :  { %p1496_p12 = scmp.ne.s32.totalorder %s187_s7, %s1495_s26  ;;  %p1501_p0 = scmp.lt.s32.totalorder %s1735_s22, %s1495_s26 }
 0x104   :  { %p1502_p1 = por %p1501_p0, %p1500_p13 }
 0x106   :  { %p1503_p2 = pnand %p1502_p1, %p1496_p12 }
 0x108   :  { %1506 = shalt.err (!%p1503_p2)  }
 0x109   :  { %189 = dma.hbm_to_vmem [thread:$0]  %s183_s21, 96, %s187_s7, [#allocation3], %s2215_s24, %s2215_s24, %s2214_s23 }
 0x10a   :  { %s1022_s27 = sshll.u32 %s195_s6, 4  ;;  %s1643_s20 = smov [#allocation2 + $0x33]  }
 0x10b   :  { %s200_s12 = sshll.u32 %s1643_s20, 4  ;;  %s197_s8 = scalar_lea.hbm %s2193_s2, %s1022_s27  ;;  %s201_s12 = int_to_ptr.vmem [resolvable:$true] %s200_s12 }
 0x10c   :  { %s1507_s19 = scalar_lea.hbm %s197_s8, 96  ;;  %p1510_p4 = scmp.lt.s32.totalorder %s197_s8, %s2193_s2 }
 0x10d   :  { %p1508_p3 = scmp.ne.s32.totalorder %s197_s8, %s1507_s19  ;;  %p1511_p5 = scmp.lt.s32.totalorder %s1726_s0, %s1507_s19 }
 0x10f   :  { %p1512_p6 = por %p1511_p5, %p1510_p4 }
 0x111   :  { %p1513_p7 = pnand %p1512_p6, %p1508_p3 }
 0x113   :  { %1516 = shalt.err (!%p1513_p7)  }
 0x114   :  { %s1517_s25 = scalar_lea.vmem %s201_s12, 96  ;;  %p1522_p9 = scmp.lt.s32.totalorder %s201_s12, %s1706_s17 }
 0x115   :  { %p1518_p8 = scmp.ne.s32.totalorder %s201_s12, %s1517_s25  ;;  %p1523_p10 = scmp.lt.s32.totalorder %s1735_s22, %s1517_s25 }
 0x117   :  { %p1524_p11 = por %p1523_p10, %p1522_p9 }
 0x119   :  { %p1525_p12 = pnand %p1524_p11, %p1518_p8 }
 0x11b   :  { %1528 = shalt.err (!%p1525_p12)  }
 0x11c   :  { %203 = dma.hbm_to_vmem [thread:$0]  %s197_s8, 96, %s201_s12, [#allocation3], %s2215_s24, %s2215_s24, %s2214_s23 }
 0x11d   :  { %s1023_s7 = sld [smem:[#allocation5 + $0xc]]  ;;  %s1644_s18 = smov [#allocation2 + $0x34]  }
 0x11e   :  { %s214_s16 = sshll.u32 %s1644_s18, 4  ;;  %s1025_s9 = sld [smem:[#allocation5 + $0xd]]  ;;  %s1938_s16 = int_to_ptr.vmem [resolvable:$true] %s214_s16 }
 0x11f   :  { %s1645_s1 = smov [#allocation2 + $0x35]   ;;  %s1940_s13 = sld [smem:[#allocation5 + $0xe]] }
 0x120   :  { %s228_s14 = sshll.u32 %s1645_s1, 4  ;;  %s1646_s28 = smov [#allocation2 + $0x36]   ;;  %s1942_s14 = int_to_ptr.vmem [resolvable:$true] %s228_s14 }
 0x121   :  { %s1944_s21 = sshll.u32 %s1646_s28, 4  ;;  %s1946_s6 = sld [smem:[#allocation5 + $0xf]]  ;;  %s243_s21 = int_to_ptr.vmem [resolvable:$true] %s1944_s21 }
 0x123   :  { %s206_s10 = sshrl.u32 %s1023_s7, 3  ;;  %s207_s4 = sand.u32 7, %s1023_s7  }
 0x124   :  { %s208_s5 = smul.u32 48, %s206_s10  ;;  %s220_s26 = sshrl.u32 %s1025_s9, 3 }
 0x125   :  { %s221_s27 = sand.u32 7, %s1025_s9   ;;  %s222_s20 = smul.u32 48, %s220_s26 }
 0x126   :  { %s209_s12 = sadd.s32 %s208_s5, %s207_s4  ;;  %s234_s11 = sshrl.u32 %s1940_s13, 3 }
 0x127   :  { %s1024_s30 = sshll.u32 %s209_s12, 4  ;;  %s223_s8 = sadd.s32 %s222_s20, %s221_s27 }
 0x128   :  { %s211_s29 = scalar_lea.hbm %s2193_s2, %s1024_s30  ;;  %s1026_s25 = sshll.u32 %s223_s8, 4 }
 0x129   :  { %s1529_s18 = scalar_lea.hbm %s211_s29, 96  ;;  %p1532_p0 = scmp.lt.s32.totalorder %s211_s29, %s2193_s2 }
 0x12a   :  { %p1530_p13 = scmp.ne.s32.totalorder %s211_s29, %s1529_s18  ;;  %p1533_p1 = scmp.lt.s32.totalorder %s1726_s0, %s1529_s18 }
 0x12c   :  { %p1534_p2 = por %p1533_p1, %p1532_p0 }
 0x12e   :  { %p1535_p3 = pnand %p1534_p2, %p1530_p13 }
 0x130   :  { %1538 = shalt.err (!%p1535_p3)  }
 0x131   :  { %s1539_s7 = scalar_lea.vmem %s1938_s16, 96  ;;  %p1544_p5 = scmp.lt.s32.totalorder %s1938_s16, %s1706_s17 }
 0x132   :  { %p1540_p4 = scmp.ne.s32.totalorder %s1938_s16, %s1539_s7  ;;  %p1545_p6 = scmp.lt.s32.totalorder %s1735_s22, %s1539_s7 }
 0x134   :  { %p1546_p7 = por %p1545_p6, %p1544_p5 }
 0x136   :  { %p1547_p8 = pnand %p1546_p7, %p1540_p4 }
 0x138   :  { %1550 = shalt.err (!%p1547_p8)  }
 0x139   :  { %217 = dma.hbm_to_vmem [thread:$0]  %s211_s29, 96, %s1938_s16, [#allocation3], %s2215_s24, %s2215_s24, %s2214_s23 }
 0x13a   :  { %s225_s4 = scalar_lea.hbm %s2193_s2, %s1026_s25  ;;  %s235_s5 = sand.u32 7, %s1940_s13  }
 0x13b   :  { %s1551_s26 = scalar_lea.hbm %s225_s4, 96  ;;  %p1554_p10 = scmp.lt.s32.totalorder %s225_s4, %s2193_s2 }
 0x13c   :  { %p1552_p9 = scmp.ne.s32.totalorder %s225_s4, %s1551_s26  ;;  %p1555_p11 = scmp.lt.s32.totalorder %s1726_s0, %s1551_s26 }
 0x13e   :  { %p1556_p12 = por %p1555_p11, %p1554_p10 }
 0x140   :  { %p1557_p13 = pnand %p1556_p12, %p1552_p9 }
 0x142   :  { %1560 = shalt.err (!%p1557_p13)  }
 0x143   :  { %s1561_s16 = scalar_lea.vmem %s1942_s14, 96  ;;  %p1566_p1 = scmp.lt.s32.totalorder %s1942_s14, %s1706_s17 }
 0x144   :  { %p1562_p0 = scmp.ne.s32.totalorder %s1942_s14, %s1561_s16  ;;  %p1567_p2 = scmp.lt.s32.totalorder %s1735_s22, %s1561_s16 }
 0x146   :  { %p1568_p3 = por %p1567_p2, %p1566_p1 }
 0x148   :  { %p1569_p4 = pnand %p1568_p3, %p1562_p0 }
 0x14a   :  { %1572 = shalt.err (!%p1569_p4)  }
 0x14b   :  { %231 = dma.hbm_to_vmem [thread:$0]  %s225_s4, 96, %s1942_s14, [#allocation3], %s2215_s24, %s2215_s24, %s2214_s23 }
 0x14c   :  { %s236_s12 = smul.u32 48, %s234_s11  ;;  %s248_s30 = sshrl.u32 %s1946_s6, 3 }
 0x14d   :  { %s249_s8 = sand.u32 7, %s1946_s6   ;;  %s250_s15 = smul.u32 48, %s248_s30 }
 0x14e   :  { %s237_s19 = sadd.s32 %s236_s12, %s235_s5 }
 0x14f   :  { %s1028_s29 = sshll.u32 %s237_s19, 4  ;;  %s251_s28 = sadd.s32 %s250_s15, %s249_s8 }
 0x150   :  { %s239_s1 = scalar_lea.hbm %s2193_s2, %s1028_s29 }
 0x151   :  { %s1573_s7 = scalar_lea.hbm %s239_s1, 96  ;;  %p1576_p6 = scmp.lt.s32.totalorder %s239_s1, %s2193_s2 }
 0x152   :  { %p1574_p5 = scmp.ne.s32.totalorder %s239_s1, %s1573_s7  ;;  %p1577_p7 = scmp.lt.s32.totalorder %s1726_s0, %s1573_s7 }
 0x154   :  { %p1578_p8 = por %p1577_p7, %p1576_p6 }
 0x156   :  { %p1579_p9 = pnand %p1578_p8, %p1574_p5 }
 0x158   :  { %1582 = shalt.err (!%p1579_p9)  }
 0x159   :  { %s1583_s14 = scalar_lea.vmem %s243_s21, 96  ;;  %p1588_p11 = scmp.lt.s32.totalorder %s243_s21, %s1706_s17 }
 0x15a   :  { %p1584_p10 = scmp.ne.s32.totalorder %s243_s21, %s1583_s14  ;;  %p1589_p12 = scmp.lt.s32.totalorder %s1735_s22, %s1583_s14 }
 0x15c   :  { %p1590_p13 = por %p1589_p12, %p1588_p11 }
 0x15e   :  { %p1591_p0 = pnand %p1590_p13, %p1584_p10 }
 0x160   :  { %1594 = shalt.err (!%p1591_p0)  }
 0x161   :  { %245 = dma.hbm_to_vmem [thread:$0]  %s239_s1, 96, %s243_s21, [#allocation3], %s2215_s24, %s2215_s24, %s2214_s23 }
 0x162   :  { %s1030_s13 = sshll.u32 %s251_s28, 4  ;;  %s1647_s6 = smov [#allocation2 + $0x37]  }
 0x163   :  { %s256_s11 = sshll.u32 %s1647_s6, 4  ;;  %s253_s26 = scalar_lea.hbm %s2193_s2, %s1030_s13  ;;  %s257_s11 = int_to_ptr.vmem [resolvable:$true] %s256_s11 }
 0x164   :  { %s1595_s27 = scalar_lea.hbm %s253_s26, 96  ;;  %p1598_p2 = scmp.lt.s32.totalorder %s253_s26, %s2193_s2 }
 0x165   :  { %p1596_p1 = scmp.ne.s32.totalorder %s253_s26, %s1595_s27  ;;  %p1599_p3 = scmp.lt.s32.totalorder %s1726_s0, %s1595_s27 }
 0x167   :  { %p1600_p4 = por %p1599_p3, %p1598_p2 }
 0x169   :  { %p1601_p5 = pnand %p1600_p4, %p1596_p1 }
 0x16b   :  { %1604 = shalt.err (!%p1601_p5)  }
 0x16c   :  { %s1605_s12 = scalar_lea.vmem %s257_s11, 96  ;;  %p1610_p7 = scmp.lt.s32.totalorder %s257_s11, %s1706_s17 }
 0x16d   :  { %p1606_p6 = scmp.ne.s32.totalorder %s257_s11, %s1605_s12  ;;  %p1611_p8 = scmp.lt.s32.totalorder %s1735_s22, %s1605_s12 }
 0x16f   :  { %p1612_p9 = por %p1611_p8, %p1610_p7 }
 0x171   :  { %p1613_p10 = pnand %p1612_p9, %p1606_p6 }
 0x173   :  { %1616 = shalt.err (!%p1613_p10)  }
 0x174   :  { %259 = dma.hbm_to_vmem [thread:$0]  %s253_s26, 96, %s257_s11, [#allocation3], %s2215_s24, %s2215_s24, %s2214_s23 }
 0x175   :  { %s1625_s21 = smov 0  }
 0x176 LB: > { %1623 = dma.done.wait [#allocation3], 96  ;;  %s1627_s21 = sphi %s1625_s21, %s265_s21  }
 0x177   : > { %1624 = vsyncadd [#allocation3], 4294967200  ;;  %s265_s21 = sadd.s32 1, %s1627_s21  }
 0x178   : > { %p262_p11 = scmp.ge.s32.totalorder %s265_s21, 16  }
 0x179   :  { %v1201_v1 = vld [vmem:[%s2194_s3 + $0x78] sm:$0xff] (%p262_p11)   ;;  %v1205_v5 = vld [vmem:[%s2194_s3 + $0x70] sm:$0xff] (%p262_p11)   ;;  %v1209_v9 = vld [vmem:[%s2194_s3 + $0x68] sm:$0xff] (%p262_p11)   ;;  %s2216_s19 = sld [smem:[#allocation27_spill]] (%p262_p11)  ;;  %vm1649_vm0 = vmmov (%p262_p11), 0   ;;  %vm845_vm1 = vcmask (%p262_p11), 523264  }
 0x17a   :  { %264 = sbr.rel (!%p262_p11) target bundleno = 374 (0x176), region = 86  ;;  %v1202_v2 = vld [vmem:[%s2194_s3 + $0x38] sm:$0xff] (%p262_p11)   ;;  %1089 = vmatprep.subr.bf16.mxu0 (%p262_p11), %v1201_v1  ;;  %v1206_v6 = vld [vmem:[%s2194_s3 + $0x30] sm:$0xff] (%p262_p11)   ;;  %v1210_v10 = vld [vmem:[%s2194_s3 + $0x28] sm:$0xff] (%p262_p11)   ;;  %s2217_s9 = sld [smem:[#allocation26_spill]] (%p262_p11)  ;;  %vm918_vm2 = vcmask (%p262_p11), 7168  }
 0x17b   :  { %v1203_v3 = vld [vmem:[%s2194_s3 + $0xf8] sm:$0xff] (%p262_p11)   ;;  %1090 = vmatpush3.bf16.msra.mxu0 (%p262_p11), %v1202_v2  ;;  %v1207_v7 = vld [vmem:[%s2194_s3 + $0xf0] sm:$0xff] (%p262_p11)   ;;  %v1211_v11 = vld [vmem:[%s2194_s3 + $0xe8] sm:$0xff] (%p262_p11)   ;;  %s2218_s13 = sld [smem:[#allocation28_spill]] (%p262_p11) }
 0x17c   :  { %v1204_v4 = vld [vmem:[%s2194_s3 + $0xb8] sm:$0xff] (%p262_p11)   ;;  %1111 = vmatprep.subr.bf16.mxu1 (%p262_p11), %v1203_v3  ;;  %1091 = vmatprep.subr.bf16.mxu0 (%p262_p11), %v1205_v5  ;;  %v1208_v8 = vld [vmem:[%s2194_s3 + $0xb0] sm:$0xff] (%p262_p11)   ;;  %v1212_v12 = vld [vmem:[%s2194_s3 + $0xa8] sm:$0xff] (%p262_p11)   ;;  %v1648_v3 = vmov (%p262_p11), 0.0   ;;  %s2219_s4 = sld [smem:[#allocation29_spill]] (%p262_p11) }
 0x17d   :  { %1112 = vmatpush3.bf16.msra.mxu1 (%p262_p11), %v1204_v4  ;;  %v1213_v13 = vld [vmem:[%s2194_s3 + $0x60] sm:$0xff] (%p262_p11)   ;;  %v1217_v17 = vld [vmem:[%s2194_s3 + $0x58] sm:$0xff] (%p262_p11)   ;;  %v1221_v21 = vld [vmem:[%s2194_s3 + $0x50] sm:$0xff] (%p262_p11)   ;;  %s2220_s27 = sld [smem:[#allocation25_spill]] (%p262_p11) }
 0x17e   :  { %1113 = vmatprep.subr.bf16.mxu1 (%p262_p11), %v1207_v7  ;;  %v1214_v14 = vld [vmem:[%s2194_s3 + $0x20] sm:$0xff] (%p262_p11)   ;;  %v1218_v18 = vld [vmem:[%s2194_s3 + $0x18] sm:$0xff] (%p262_p11)   ;;  %v1222_v22 = vld [vmem:[%s2194_s3 + $0x10] sm:$0xff] (%p262_p11)   ;;  %s2221_s2 = sld [smem:[#allocation30_spill]] (%p262_p11) }
 0x17f   :  { %1092 = vmatpush3.bf16.msra.mxu0 %v1206_v6  ;;  %v1215_v15 = vld [vmem:[%s2194_s3 + $0xe0] sm:$0xff]   ;;  %v1219_v19 = vld [vmem:[%s2194_s3 + $0xd8] sm:$0xff]   ;;  %v1223_v23 = vld [vmem:[%s2194_s3 + $0xd0] sm:$0xff]  }
 0x180   :  { %1093 = vmatprep.subr.bf16.mxu0 %v1209_v9  ;;  %v1216_v16 = vld [vmem:[%s2194_s3 + $0xa0] sm:$0xff]   ;;  %v1220_v20 = vld [vmem:[%s2194_s3 + $0x98] sm:$0xff]   ;;  %v1224_v24 = vld [vmem:[%s2194_s3 + $0x90] sm:$0xff]  }
 0x181   :  { %1114 = vmatpush3.bf16.msra.mxu1 %v1208_v8  ;;  %v1225_v25 = vld [vmem:[%s2194_s3 + $0x48] sm:$0xff]   ;;  %v1229_v29 = vld [vmem:[%s2194_s3 + $0x40] sm:$0xff]   ;;  %v276_v33 = vld [vmem:[#allocation2 + $0x38] sm:$0xff] }
 0x182   :  { %1115 = vmatprep.subr.bf16.mxu1 %v1211_v11  ;;  %v1226_v26 = vld [vmem:[%s2194_s3 + $0x8] sm:$0xff]   ;;  %v1230_v30 = vld [vmem:[%s2194_s3] sm:$0xff]   ;;  %v275_v37 = vld [vmem:[#allocation2 + $0x30] sm:$0xff] }
 0x183   :  { %1094 = vmatpush3.bf16.msra.mxu0 %v1210_v10  ;;  %v1227_v27 = vld [vmem:[%s2194_s3 + $0xc8] sm:$0xff]   ;;  %v1231_v31 = vld [vmem:[%s2194_s3 + $0xc0] sm:$0xff]   ;;  %v1233_v39 = vld [vmem:[%s2194_s3 + $0x178] sm:$0xff]  }
 0x184   :  { %1095 = vmatprep.subr.bf16.mxu0 %v1213_v13  ;;  %v1228_v28 = vld [vmem:[%s2194_s3 + $0x88] sm:$0xff]   ;;  %v1232_v35 = vld [vmem:[%s2194_s3 + $0x80] sm:$0xff]   ;;  %v272_v40 = vld [vmem:[#allocation2 + $0x18] sm:$0xff] }
 0x185   :  { %1116 = vmatpush3.bf16.msra.mxu1 %v1212_v12  ;;  %v270_v32 = vld [vmem:[#allocation2 + $0x8] sm:$0xff]  ;;  %v269_v36 = vld [vmem:[#allocation2] sm:$0xff]  ;;  %v1234_v43 = vld [vmem:[%s2194_s3 + $0x138] sm:$0xff]  }
 0x186   :  { %1117 = vmatprep.subr.bf16.mxu1 %v1215_v15  ;;  %v282_v34 = vpack.c.bf16 %v276_v33, %v270_v32  ;;  %v281_v38 = vpack.c.bf16 %v275_v37, %v269_v36  ;;  %v278_v41 = vld [vmem:[#allocation2 + $0x48] sm:$0xff]  ;;  %v271_v44 = vld [vmem:[#allocation2 + $0x10] sm:$0xff]  ;;  %v277_v45 = vld [vmem:[#allocation2 + $0x40] sm:$0xff] }
 0x187   :  { %1096 = vmatpush3.bf16.msra.mxu0 %v1214_v14  ;;  %v284_v42 = vpack.c.bf16 %v278_v41, %v272_v40  ;;  %v283_v46 = vpack.c.bf16 %v277_v45, %v271_v44  ;;  %v1235_v47 = vld [vmem:[%s2194_s3 + $0x170] sm:$0xff]   ;;  %v1237_v49 = vld [vmem:[%s2194_s3 + $0x168] sm:$0xff]   ;;  %v1239_v51 = vld [vmem:[%s2194_s3 + $0x160] sm:$0xff]  }
 0x188   :  { %1097 = vmatprep.subr.bf16.mxu0 %v1217_v17  ;;  %712 = vmatprep.mubr.bf16.mxu0 %v282_v34  ;;  %v1236_v48 = vld [vmem:[%s2194_s3 + $0x130] sm:$0xff]   ;;  %v1238_v50 = vld [vmem:[%s2194_s3 + $0x128] sm:$0xff]   ;;  %v1240_v52 = vld [vmem:[%s2194_s3 + $0x120] sm:$0xff]  }
 0x189   :  { %1118 = vmatpush3.bf16.msra.mxu1 %v1216_v16  ;;  %753 = vmatprep.mubr.bf16.mxu1 %v284_v42  ;;  %v1241_v53 = vld [vmem:[%s2194_s3 + $0x158] sm:$0xff]   ;;  %v1243_v55 = vld [vmem:[%s2194_s3 + $0x150] sm:$0xff]   ;;  %v274_v56 = vld [vmem:[#allocation2 + $0x28] sm:$0xff] }
 0x18a   :  { %1119 = vmatprep.subr.bf16.mxu1 %v1219_v19  ;;  %v1242_v54 = vld [vmem:[%s2194_s3 + $0x118] sm:$0xff]   ;;  %v1244_v57 = vld [vmem:[%s2194_s3 + $0x110] sm:$0xff]   ;;  %v1245_v60 = vld [vmem:[%s2194_s3 + $0x148] sm:$0xff]  }
 0x18b   :  { %1098 = vmatpush3.bf16.msra.mxu0 %v1218_v18  ;;  %v280_v58 = vld [vmem:[#allocation2 + $0x58] sm:$0xff]  ;;  %v1246_v61 = vld [vmem:[%s2194_s3 + $0x108] sm:$0xff]   ;;  %v1247_v62 = vld [vmem:[%s2194_s3 + $0x140] sm:$0xff]  }
 0x18c   :  { %1099 = vmatprep.subr.bf16.mxu0 %v1221_v21  ;;  %v286_v59 = vpack.c.bf16 %v280_v58, %v274_v56  ;;  %v1248_v63 = vld [vmem:[%s2194_s3 + $0x100] sm:$0xff]   ;;  %v279_v1 = vld [vmem:[#allocation2 + $0x50] sm:$0xff]  ;;  %v1249_v4 = vld [vmem:[%s2216_s19 + $0x18] sm:$0xff]  }
 0x18d   :  { %1120 = vmatpush3.bf16.msra.mxu1 %v1220_v20  ;;  %v273_v0 = vld [vmem:[#allocation2 + $0x20] sm:$0xff]  ;;  %v1250_v5 = vld [vmem:[%s2216_s19 + $0x10] sm:$0xff]   ;;  %v1251_v6 = vld [vmem:[%s2216_s19 + $0x8] sm:$0xff]  }
 0x18e   :  { %1121 = vmatprep.subr.bf16.mxu1 %v1223_v23  ;;  %v285_v2 = vpack.c.bf16 %v279_v1, %v273_v0  ;;  %v1252_v7 = vld [vmem:[%s2216_s19] sm:$0xff]  }
 0x18f   :  { %1100 = vmatpush3.bf16.msra.mxu0 %v1222_v22  ;;  %v1031_v16 = vld [vmem:[%s2217_s9] ss:$0 sm:$0xff] }
 0x190   :  { %1101 = vmatprep.subr.bf16.mxu0 %v1225_v25  ;;  %v1080_v36 = vld [vmem:[%s2218_s13] ss:$0 sm:$0xff] }
 0x191   :  { %1122 = vmatpush3.bf16.msra.mxu1 %v1224_v24  ;;  %v1086_v40 = vld [vmem:[%s2219_s4] ss:$0 sm:$0xff] }
 0x192   :  { %1123 = vmatprep.subr.bf16.mxu1 %v1227_v27 }
 0x193   :  { %1102 = vmatpush3.bf16.msra.mxu0 %v1226_v26 }
 0x194   :  { %1103 = vmatprep.subr.bf16.mxu0 %v1229_v29 }
 0x195   :  { %1124 = vmatpush3.bf16.msra.mxu1 %v1228_v28 }
 0x196   :  { %1125 = vmatprep.subr.bf16.mxu1 %v1231_v31 }
 0x197   :  { %1104 = vmatpush3.bf16.msra.mxu0 %v1230_v30 }
 0x198   :  { %1133 = vmatprep.subr.bf16.mxu0 %v1233_v39 }
 0x199   :  { %1126 = vmatpush3.bf16.msra.mxu1 %v1232_v35 }
 0x19a   :  { %713 = vmatmul.mubr.bf16.vlgmr.msra.gmra.mxu0 %v281_v38  ;;  %1160 = vmatprep.subr.bf16.mxu1 %v1648_v3 }
 0x19b   :  { %1134 = vmatpush3.bf16.msra.mxu0 %v1234_v43  ;;  %794 = vmatprep.mubr.bf16.mxu0 %v286_v59 }
 0x19c   :  { %754 = vmatmul.mubr.bf16.vlgmr.msra.gmra.mxu1 %v283_v46  ;;  %1135 = vmatprep.subr.bf16.mxu0 %v1235_v47 }
 0x19d   :  { %1161 = vmatpush3.bf16.msra.mxu1 %v1249_v4  ;;  %1168 = vmatprep.mubr.msk.bf16.mxu1 %vm1649_vm0, %v1648_v3 }
 0x19e   :  { %1162 = vmatprep.subr.bf16.mxu1 %v1648_v3 }
 0x19f   :  { %1136 = vmatpush3.bf16.msra.mxu0 %v1236_v48 }
 0x1a0   :  { %1137 = vmatprep.subr.bf16.mxu0 %v1237_v49 }
 0x1a1   :  { %1163 = vmatpush3.bf16.msra.mxu1 %v1250_v5 }
 0x1a2   :  { %1164 = vmatprep.subr.bf16.mxu1 %v1648_v3 }
 0x1a3   :  { %1138 = vmatpush3.bf16.msra.mxu0 %v1238_v50  ;;  %v1087_v50 = vld [vmem:[#allocation6] ss:$0 sm:$0xff] }
 0x1a4   :  { %1139 = vmatprep.subr.bf16.mxu0 %v1239_v51  ;;  %v287_v51 = vld [vmem:[%s2220_s27] sm:$0xff] }
 0x1a5   :  { %1165 = vmatpush3.bf16.msra.mxu1 %v1251_v6 }
 0x1a6   :  { %1166 = vmatprep.subr.bf16.mxu1 %v1648_v3 }
 0x1a7   :  { %1140 = vmatpush3.bf16.msra.mxu0 %v1240_v52 }
 0x1a8   :  { %1141 = vmatprep.subr.bf16.mxu0 %v1241_v53 }
 0x1a9   :  { %1167 = vmatpush3.bf16.msra.mxu1 %v1252_v7 }
 0x1ab   :  { %1142 = vmatpush3.bf16.msra.mxu0 %v1242_v54 }
 0x1ac   :  { %1143 = vmatprep.subr.bf16.mxu0 %v1243_v55  ;;  %v288_v55 = vld [vmem:[%s2220_s27 + $0x8] sm:$0xff] }
 0x1af   :  { %1144 = vmatpush3.bf16.msra.mxu0 %v1244_v57 }
 0x1b0   :  { %1145 = vmatprep.subr.bf16.mxu0 %v1245_v60 }
 0x1b3   :  { %1146 = vmatpush3.bf16.msra.mxu0 %v1246_v61 }
 0x1b4   :  { %1147 = vmatprep.subr.bf16.mxu0 %v1247_v62 }
 0x1b7   :  { %1148 = vmatpush3.bf16.msra.mxu0 %v1248_v63 }
 0x1ba   :  { %795 = vmatmul.mubr.bf16.vlgmr.msra.gmra.mxu0 %v285_v2 }
 0x25a   :  { %v1105_v8 = vpop.f32.mrf.mxu0 }
 0x25c   :  { %v1106_v9 = vpop.f32.mrf.mxu0  ;;  %v1127_v10 = vpop.f32.mrf.mxu1 }
 0x25d   :  { %v1107_v15 = vadd.f32 %v1106_v9, %v1105_v8 }
 0x25e   :  { %v1108_v11 = vpop.f32.mrf.mxu0  ;;  %v1128_v12 = vpop.f32.mrf.mxu1 }
 0x25f   :  { %v715_v20 = vadd.f32 %v1107_v15, %v1031_v16  ;;  %v1129_v21 = vadd.f32 %v1128_v12, %v1127_v10 }
 0x260   :  { %v1109_v13 = vpop.f32.mrf.mxu0  ;;  %v1130_v14 = vpop.f32.mrf.mxu1 }
 0x261   :  { %v1110_v17 = vadd.f32 %v1109_v13, %v1108_v11  ;;  %v756_v27 = vadd.f32 %v1129_v21, %v715_v20 }
 0x262   :  { %v1131_v18 = vpop.f32.mrf.mxu1 }
 0x263   :  { %v718_v23 = vadd.f32 %v1110_v17, %v1031_v16  ;;  %v1132_v24 = vadd.f32 %v1131_v18, %v1130_v14 }
 0x265   :  { %v759_v29 = vadd.f32 %v1132_v24, %v718_v23 }
 0x27a   :  { %v1149_v19 = vpop.f32.mrf.mxu0 }
 0x27c   :  { %v1150_v22 = vpop.f32.mrf.mxu0 }
 0x27d   :  { %v1151_v25 = vadd.f32 %v1150_v22, %v1149_v19 }
 0x27e   :  { %v1152_v26 = vpop.f32.mrf.mxu0 }
 0x27f   :  { %v797_v30 = vadd.f32 %v1151_v25, %v756_v27 }
 0x280   :  { %v1153_v28 = vpop.f32.mrf.mxu0 }
 0x281   :  { %v1154_v31 = vadd.f32 %v1153_v28, %v1152_v26  ;;  %v803_v33 = vmax.f32 %v797_v30, 0.0 }
 0x283   :  { %v800_v32 = vadd.f32 %v1154_v31, %v759_v29 }
 0x285   :  { %v804_v34 = vmax.f32 %v800_v32, 0.0 }
 0x287   :  { %v805_v35 = vpack.c.bf16 %v804_v34, %v803_v33 }
 0x289   :  { %1169 = vmatmul.mubr.msk.bf16.vlgmr.msra.gmra.mxu1 %vm845_vm1, %v805_v35 }
 0x349   :  { %v883_v37 = vpop.f32.mrf.mxu1 }
 0x34a   :  { %v884_v38 = vadd.f32 %v1080_v36, %v883_v37 }
 0x34b   :  { %v1170_v39 = vpop.f32.mrf.mxu1 }
 0x34c   :  { %v890_v41 = vmax.f32 %v884_v38, 0.0 }
 0x34d   :  { %v886_v42 = vpop.f32.mrf.mxu1 }
 0x34e   :  { %v887_v43 = vadd.f32 %v1080_v36, %v886_v42  ;;  %v899_v44 = vmul.f32 %v1086_v40, %v890_v41 }
 0x34f   :  { %v1171_v45 = vpop.f32.mrf.mxu1 }
 0x350   :  { %v891_v46 = vmax.f32 %v887_v43, 0.0  ;;  %v901_v47 = vsel %vm845_vm1, %v899_v44, 0.0 }
 0x351   :  { %902 = vadd.xlane.f32.xlu0 %v901_v47 }
 0x352   :  { %v900_v48 = vmul.f32 %v1086_v40, %v891_v46 }
 0x354   :  { %v904_v49 = vsel %vm845_vm1, %v900_v48, 0.0 }
 0x355   :  { %905 = vadd.xlane.f32.xlu0 %v904_v49 }
 0x3da   :  { %v903_v52 = vpop.xlane.xlu0 %902 }
 0x3db   :  { %v914_v53 = vadd.f32 %v1087_v50, %v903_v52 }
 0x3dd   :  { %v916_v54 = vmul.f32 %v914_v53, %v287_v51 }
 0x3de   :  { %v906_v56 = vpop.xlane.xlu0 %905 }
 0x3df   :  { %919 = vst.msk [vmem:[%s2221_s2] sm:$0xff] %vm918_vm2, %v916_v54  ;;  %v915_v57 = vadd.f32 %v1087_v50, %v906_v56 }
 0x3e1   :  { %v917_v58 = vmul.f32 %v915_v57, %v288_v55 }
 0x3e3   :  { %920 = vst.msk [vmem:[%s2221_s2 + $0x8] sm:$0xff] %vm918_vm2, %v917_v58 }
 0x3e4   :  { %925 = vsyncmov [#allocation3] }
 0x3e7   :  { %s926_s22 = vpop.sfrf %925 }
 0x3e8   :  { %p1088_p12 = scmp.ne.s32.totalorder %s926_s22, 0 }
 0x3ea   :  { %930 = shalt.err (%p1088_p12)  }

</bundles_post_ra>
